<compile_context>
chip_gen: v5e
topology: v5e:2x2
jax: 0.10.0
libtpu: 0.0.40
codegen_flags: <defaults>
</compile_context>

<pallas_src>
import functools

import jax
import jax.numpy as jnp
from jax import lax
from jax.experimental import pallas as pl
from jax.experimental.pallas import tpu as pltpu


_LANE = 128
_SUBLANE = 8
_VMEM_LIMIT = 32 * 1024 * 1024  # conservative: fits v5e/v6e scoped VMEM and v7x (64 MiB)


def _round_up(x, m):
    return (x + m - 1) // m * m


def _pick_tile(m, target=512):
    """Pad m to a multiple of 128; pick the largest tile (<= target, multiple of 128)
    that divides the padded extent.  Returns (m_padded, tile)."""
    m_pad = _round_up(m, _LANE)
    tile = _LANE
    t = _LANE
    while t <= min(target, m_pad):
        if m_pad % t == 0:
            tile = t
        t += _LANE
    return m_pad, tile


# ----------------------------- Pallas kernels ------------------------------

def _fused_conv3_gelu_kernel(x_ref, mask_ref, w1_ref, b1_ref, w2_ref, b2_ref,
                             w3_ref, b3_ref, o_ref, *, taps, halo, tm):
    """Three fused shifted-slice convs + bias + exact-erf GELU + border re-zeroing.

    x_ref:    (1, Cin_pad, W_in)  halo'd flat-spatial input tile (lane = flat pixels),
                                  W_in >= tm + 6*halo
    mask_ref: (1, 1, W_in)        1.0 on interior pixels, 0.0 on border ring / M padding,
                                  aligned with x_ref columns
    w*_ref:   (Cout_pad, K*)      K = k*k*Cin_pad of that stage, tap-major columns
    b*_ref:   (Cout_pad, 1)
    o_ref:    (Cout_pad, tm)      lane-dense output tile (conv3 output)
    """
    h = halo
    xh = x_ref[0]          # (Cin_pad, W_in), column c == flat position tile_start - 3h + c
    msk = mask_ref[0]      # (1, W_in), same alignment as xh

    def conv_gelu_mask(src, w_ref, b_ref, out_len, mask_off):
        # src column c corresponds to flat position (tile_start - mask_off - h + c);
        # output column e corresponds to flat position (tile_start - mask_off + h*0 + e)
        # shifted appropriately -> tap d reads src column e + d + h (always in-bounds).
        patch = jnp.concatenate(
            [src[:, h + d: h + d + out_len] for d in taps], axis=0)
        acc = jnp.dot(w_ref[...], patch, preferred_element_type=jnp.float32)
        acc = acc + b_ref[...]
        # exact (erf-based) GELU, matching torch.nn.GELU() default
        acc = 0.5 * acc * (1.0 + lax.erf(acc * 0.7071067811865476))
        # zero the spatial border ring so this output doubles as the next conv's
        # padded input (and so out-of-image halo garbage never propagates).
        return acc * msk[:, mask_off: mask_off + out_len]

    y1 = conv_gelu_mask(xh, w1_ref, b1_ref, tm + 4 * h, h)        # flat [-2h, tm+2h)
    y2 = conv_gelu_mask(y1, w2_ref, b2_ref, tm + 2 * h, 2 * h)    # flat [-h,  tm+h)
    y3 = conv_gelu_mask(y2, w3_ref, b3_ref, tm, 3 * h)            # flat [0,   tm)
    o_ref[...] = y3.astype(o_ref.dtype)


def _pool_bn_kernel(win_ref, scale_ref, shift_ref, o_ref, *, pool_type, inv_count):
    """Fused pooling reduction + BatchNorm affine, lane-dense output.

    win_ref: (P, C_pad, tmo) stacked pooling windows; scale/shift: (C_pad, 1)."""
    w = win_ref[...]
    if pool_type == "max":
        r = jnp.max(w, axis=0)
    else:
        # NOTE: 1/P is only valid for VALID pooling without padding (true here).
        r = jnp.sum(w, axis=0) * inv_count
    o_ref[...] = (r * scale_ref[...] + shift_ref[...]).astype(o_ref.dtype)


# ------------------------------ wrappers ------------------------------------

def fused_conv_gelu3(x_flat, mask_flat, w_flats, b_cols, *, taps, halo, tm):
    """x_flat: (Cin_pad, M_pad) flat padded-spatial activations (zero border ring).
    mask_flat: (1, M_pad) interior mask.  Returns (Cout_pad, M_pad) = the third
    border-masked gelu(conv(.)) stage on the same flat grid."""
    cin_pad, m_pad = x_flat.shape
    w1_f, w2_f, w3_f = w_flats
    b1_c, b2_c, b3_c = b_cols
    cout_pad = w1_f.shape[0]
    n_tiles = m_pad // tm
    w_in = _round_up(tm + 6 * halo, _LANE)

    # Halo'd tiles are cut wrapper-side (BlockSpec blocks cannot overlap): one
    # modest activation copy for all three fused convs (instead of one per conv).
    left = 3 * halo
    right = max(w_in - tm - 3 * halo, 0)
    xp = jnp.pad(x_flat, ((0, 0), (left, right)))
    mp_ = jnp.pad(mask_flat, ((0, 0), (left, right)))
    x_tiles = jnp.stack([xp[:, i * tm: i * tm + w_in] for i in range(n_tiles)], axis=0)
    m_tiles = jnp.stack([mp_[:, i * tm: i * tm + w_in] for i in range(n_tiles)], axis=0)

    kernel = functools.partial(_fused_conv3_gelu_kernel, taps=taps, halo=halo, tm=tm)
    return pl.pallas_call(
        kernel,
        out_shape=jax.ShapeDtypeStruct((cout_pad, m_pad), x_flat.dtype),
        grid_spec=pltpu.PrefetchScalarGridSpec(
            num_scalar_prefetch=0,
            grid=(n_tiles,),
            in_specs=[
                pl.BlockSpec((1, cin_pad, w_in), lambda i: (i, 0, 0)),
                pl.BlockSpec((1, 1, w_in), lambda i: (i, 0, 0)),
                pl.BlockSpec(w1_f.shape, lambda i: (0, 0)),   # resident weights
                pl.BlockSpec(b1_c.shape, lambda i: (0, 0)),   # resident bias
                pl.BlockSpec(w2_f.shape, lambda i: (0, 0)),
                pl.BlockSpec(b2_c.shape, lambda i: (0, 0)),
                pl.BlockSpec(w3_f.shape, lambda i: (0, 0)),
                pl.BlockSpec(b3_c.shape, lambda i: (0, 0)),
            ],
            out_specs=pl.BlockSpec((cout_pad, tm), lambda i: (0, i)),
        ),
        compiler_params=pltpu.CompilerParams(
            dimension_semantics=("parallel",),
            vmem_limit_bytes=_VMEM_LIMIT),
    )(x_tiles, m_tiles, w1_f, b1_c, w2_f, b2_c, w3_f, b3_c)


def pool_bn(windows, scale_col, shift_col, *, pool_type, tmo):
    """windows: (P, C_pad, Mo_pad).  Fused pool-reduce over P + BN affine, tiled over Mo."""
    p, c_pad, mo_pad = windows.shape
    kernel = functools.partial(
        _pool_bn_kernel, pool_type=pool_type, inv_count=1.0 / float(p))
    return pl.pallas_call(
        kernel,
        out_shape=jax.ShapeDtypeStruct((c_pad, mo_pad), windows.dtype),
        grid_spec=pltpu.PrefetchScalarGridSpec(
            num_scalar_prefetch=0,
            grid=(mo_pad // tmo,),
            in_specs=[
                pl.BlockSpec((p, c_pad, tmo), lambda i: (0, 0, i)),
                pl.BlockSpec((c_pad, 1), lambda i: (0, 0)),
                pl.BlockSpec((c_pad, 1), lambda i: (0, 0)),
            ],
            out_specs=pl.BlockSpec((c_pad, tmo), lambda i: (0, i)),
        ),
        compiler_params=pltpu.CompilerParams(
            dimension_semantics=("parallel",),
            vmem_limit_bytes=_VMEM_LIMIT),
    )(windows, scale_col, shift_col)


def conv_block_forward(x_nchw, params, *, kernel_size, stride, pool,
                       pool_type="max", bn_eps=1e-5):
    (w1, b1, w2, b2, w3, b3, gamma, beta, run_mean, run_var) = params
    # TODO(synk): only stride=1 (same-size convs, padding=k//2, odd k) is implemented in
    #             the flat-padded-grid scheme.
    assert stride == 1 and kernel_size % 2 == 1
    k = kernel_size
    p = k // 2
    n, cin, h, w = x_nchw.shape
    cout = w1.shape[0]
    hp, wp = h + 2 * p, w + 2 * p
    mp = n * hp * wp
    m_pad, tm = _pick_tile(mp)
    cin_pad = _round_up(cin, _SUBLANE)
    cout_pad = _round_up(cout, _SUBLANE)
    halo = p * wp + p
    taps = tuple((kh - p) * wp + (kw - p) for kh in range(k) for kw in range(k))

    # interior mask: 1 on real conv-output pixels, 0 on the zero-pad border ring / M tail
    m2 = jnp.zeros((hp, wp), x_nchw.dtype).at[p:p + h, p:p + w].set(1.0)
    mask = jnp.tile(m2.reshape(-1), (n,))
    mask = jnp.pad(mask, (0, m_pad - mp)).reshape(1, m_pad)

    def prep_w(wgt, ci_pad):
        co, ci = wgt.shape[:2]
        wpd = jnp.pad(wgt, ((0, cout_pad - co), (0, ci_pad - ci), (0, 0), (0, 0)))
        # (Cout_pad, Cin_pad, kh, kw) -> (Cout_pad, kh, kw, Cin_pad) -> (Cout_pad, K)
        return jnp.transpose(wpd, (0, 2, 3, 1)).reshape(cout_pad, k * k * ci_pad)

    def prep_b(bias):
        return jnp.pad(bias, (0, cout_pad - bias.shape[0])).reshape(cout_pad, 1)

    # NCHW -> zero-padded, channel-padded, channels-first flat layout (Cin_pad, M_pad)
    xpad = jnp.pad(x_nchw, ((0, 0), (0, cin_pad - cin), (p, p), (p, p)))
    x_flat = jnp.transpose(xpad, (1, 0, 2, 3)).reshape(cin_pad, mp)
    x_flat = jnp.pad(x_flat, ((0, 0), (0, m_pad - mp)))

    # ---- fused conv1+GELU -> conv2+GELU -> conv3+GELU, single pallas_call
    w_flats = (prep_w(w1, cin_pad), prep_w(w2, cout_pad), prep_w(w3, cout_pad))
    b_cols = (prep_b(b1), prep_b(b2), prep_b(b3))
    y = fused_conv_gelu3(x_flat, mask, w_flats, b_cols, taps=taps, halo=halo, tm=tm)

    # ---- MaxPool2d(pool, stride=pool[1]) + BatchNorm2d (eval) + Dropout(eval)=identity
    # TODO(synk): pool+BN could ideally be folded into the conv3 epilogue; kept as a
    #             separate lane-dense Pallas kernel (in-kernel strided window extraction
    #             across spatial rows would need gathers on the flat lane axis).
    ph, pw_ = pool
    s = pool[1]
    ho = (h - ph) // s + 1
    wo = (w - pw_) // s + 1
    y_sp = y[:, :mp].reshape(cout_pad, n, hp, wp)[:, :, p:p + h, p:p + w]
    wins = [y_sp[:, :, i:i + s * ho:s, j:j + s * wo:s]
            for i in range(ph) for j in range(pw_)]
    mo = n * ho * wo
    mo_pad, tmo = _pick_tile(mo)
    windows = jnp.stack(wins, axis=0).reshape(ph * pw_, cout_pad, mo)
    windows = jnp.pad(windows, ((0, 0), (0, 0), (0, mo_pad - mo)))

    scale = gamma / jnp.sqrt(run_var + bn_eps)
    shift = beta - run_mean * scale
    scale_p = jnp.pad(scale, (0, cout_pad - cout)).reshape(cout_pad, 1)
    shift_p = jnp.pad(shift, (0, cout_pad - cout)).reshape(cout_pad, 1)

    pooled = pool_bn(windows, scale_p, shift_p, pool_type=pool_type, tmo=tmo)
    out = pooled[:cout, :mo].reshape(cout, n, ho, wo)
    return jnp.transpose(out, (1, 0, 2, 3))        # -> NCHW


# ------------------------------ reference -----------------------------------

def reference_forward(x_nchw, params, *, kernel_size, stride, pool, bn_eps=1e-5):
    (w1, b1, w2, b2, w3, b3, gamma, beta, run_mean, run_var) = params
    k = kernel_size
    p = k // 2

    def conv(x, w, b):
        y = lax.conv_general_dilated(
            x, w, (stride, stride), [(p, p), (p, p)],
            dimension_numbers=("NCHW", "OIHW", "NCHW"))
        return y + b.reshape(1, -1, 1, 1)

    def gelu(v):
        return 0.5 * v * (1.0 + lax.erf(v * 0.7071067811865476))

    y = gelu(conv(x_nchw, w1, b1))
    y = gelu(conv(y, w2, b2))
    y = gelu(conv(y, w3, b3))
    ph, pw = pool
    s = pool[1]
    y = lax.reduce_window(y, -jnp.inf, lax.max,
                          (1, 1, ph, pw), (1, 1, s, s), "VALID")
    scale = gamma / jnp.sqrt(run_var + bn_eps)
    shift = beta - run_mean * scale
    return y * scale.reshape(1, -1, 1, 1) + shift.reshape(1, -1, 1, 1)


# --------------------------------- main --------------------------------------

if __name__ == "__main__":
    in_channels, out_channels = 4, 8
    kernel_size, stride, pool = 3, 1, (2, 2)
    N, H, W = 2, 16, 16

    key = jax.random.PRNGKey(0)
    ks = jax.random.split(key, 9)

    def conv_init(kw_key, kb_key, cin, cout):
        fan_in = cin * kernel_size * kernel_size
        bound = 1.0 / (fan_in ** 0.5)
        w = jax.random.uniform(kw_key, (cout, cin, kernel_size, kernel_size),
                               jnp.float32, -bound, bound)
        b = jax.random.uniform(kb_key, (cout,), jnp.float32, -bound, bound)
        return w, b

    w1, b1 = conv_init(ks[0], ks[1], in_channels, out_channels)
    w2, b2 = conv_init(ks[2], ks[3], out_channels, out_channels)
    w3, b3 = conv_init(ks[4], ks[5], out_channels, out_channels)
    gamma = jax.random.uniform(ks[6], (out_channels,), jnp.float32, 0.5, 1.5)
    beta = jax.random.uniform(ks[7], (out_channels,), jnp.float32, -0.5, 0.5)
    run_mean = jnp.zeros((out_channels,), jnp.float32)
    run_var = jnp.ones((out_channels,), jnp.float32)
    params = (w1, b1, w2, b2, w3, b3, gamma, beta, run_mean, run_var)

    x = jax.random.normal(ks[8], (N, in_channels, H, W), jnp.float32)  # NCHW input

    out = conv_block_forward(x, params, kernel_size=kernel_size,
                             stride=stride, pool=pool, pool_type="max")
    out = jax.block_until_ready(out)

    ref = reference_forward(x, params, kernel_size=kernel_size,
                            stride=stride, pool=pool)
    assert out.shape == ref.shape, (out.shape, ref.shape)
    assert jnp.allclose(out, ref, rtol=1e-3, atol=1e-4), float(
        jnp.max(jnp.abs(out - ref)))

    print("KERNEL_OK")
</pallas_src>

<mosaic_0001>
module attributes {stable_mosaic.version = 11 : i64} {
  func.func @_fused_conv3_gelu_kernel(%arg0: i32, %arg1: memref<1x8x512xf32, #tpu.memory_space<vmem>>, %arg2: memref<1x1x512xf32, #tpu.memory_space<vmem>>, %arg3: memref<8x72xf32, #tpu.memory_space<vmem>>, %arg4: memref<8x1xf32, #tpu.memory_space<vmem>>, %arg5: memref<8x72xf32, #tpu.memory_space<vmem>>, %arg6: memref<8x1xf32, #tpu.memory_space<vmem>>, %arg7: memref<8x72xf32, #tpu.memory_space<vmem>>, %arg8: memref<8x1xf32, #tpu.memory_space<vmem>>, %arg9: memref<8x384xf32, #tpu.memory_space<vmem>>) attributes {dimension_semantics = [#tpu.dimension_semantics<parallel>], iteration_bounds = array<i64: 2>, scalar_prefetch = 0 : i64, scratch_operands = 0 : i64, tpu.core_type = #tpu.core_type<tc>, window_params = [{transform_indices = @transform_0, window_bounds = array<i64: 1, 8, 512>}, {transform_indices = @transform_1, window_bounds = array<i64: 1, 1, 512>}, {pipeline_mode = #tpu.pipeline_mode<synchronous>, transform_indices = @transform_2, window_bounds = array<i64: 8, 72>}, {pipeline_mode = #tpu.pipeline_mode<synchronous>, transform_indices = @transform_3, window_bounds = array<i64: 8, 1>}, {pipeline_mode = #tpu.pipeline_mode<synchronous>, transform_indices = @transform_4, window_bounds = array<i64: 8, 72>}, {pipeline_mode = #tpu.pipeline_mode<synchronous>, transform_indices = @transform_5, window_bounds = array<i64: 8, 1>}, {pipeline_mode = #tpu.pipeline_mode<synchronous>, transform_indices = @transform_6, window_bounds = array<i64: 8, 72>}, {pipeline_mode = #tpu.pipeline_mode<synchronous>, transform_indices = @transform_7, window_bounds = array<i64: 8, 1>}, {transform_indices = @transform_8, window_bounds = array<i64: 8, 384>}]} {
    %c0 = arith.constant 0 : index
    %c0_0 = arith.constant 0 : index
    %c0_1 = arith.constant 0 : index
    %0 = vector.load %arg1[%c0, %c0_0, %c0_1] : memref<1x8x512xf32, #tpu.memory_space<vmem>>, vector<1x8x512xf32>
    %1 = vector.shape_cast %0 : vector<1x8x512xf32> to vector<8x512xf32>
    %c0_2 = arith.constant 0 : index
    %c0_3 = arith.constant 0 : index
    %c0_4 = arith.constant 0 : index
    %2 = vector.load %arg2[%c0_2, %c0_3, %c0_4] : memref<1x1x512xf32, #tpu.memory_space<vmem>>, vector<1x1x512xf32>
    %3 = vector.shape_cast %2 : vector<1x1x512xf32> to vector<1x512xf32>
    %4 = vector.extract_strided_slice %1 {offsets = [0, 0], sizes = [8, 460], strides = [1, 1]} : vector<8x512xf32> to vector<8x460xf32>
    %5 = vector.extract_strided_slice %1 {offsets = [0, 1], sizes = [8, 460], strides = [1, 1]} : vector<8x512xf32> to vector<8x460xf32>
    %6 = vector.extract_strided_slice %1 {offsets = [0, 2], sizes = [8, 460], strides = [1, 1]} : vector<8x512xf32> to vector<8x460xf32>
    %7 = vector.extract_strided_slice %1 {offsets = [0, 18], sizes = [8, 460], strides = [1, 1]} : vector<8x512xf32> to vector<8x460xf32>
    %8 = vector.extract_strided_slice %1 {offsets = [0, 19], sizes = [8, 460], strides = [1, 1]} : vector<8x512xf32> to vector<8x460xf32>
    %9 = vector.extract_strided_slice %1 {offsets = [0, 20], sizes = [8, 460], strides = [1, 1]} : vector<8x512xf32> to vector<8x460xf32>
    %10 = vector.extract_strided_slice %1 {offsets = [0, 36], sizes = [8, 460], strides = [1, 1]} : vector<8x512xf32> to vector<8x460xf32>
    %11 = vector.extract_strided_slice %1 {offsets = [0, 37], sizes = [8, 460], strides = [1, 1]} : vector<8x512xf32> to vector<8x460xf32>
    %12 = vector.extract_strided_slice %1 {offsets = [0, 38], sizes = [8, 460], strides = [1, 1]} : vector<8x512xf32> to vector<8x460xf32>
    %13 = tpu.concatenate %4, %5, %6, %7, %8, %9, %10, %11, %12 in 0 : vector<8x460xf32>, vector<8x460xf32>, vector<8x460xf32>, vector<8x460xf32>, vector<8x460xf32>, vector<8x460xf32>, vector<8x460xf32>, vector<8x460xf32>, vector<8x460xf32> -> vector<72x460xf32>
    %c0_5 = arith.constant 0 : index
    %c0_6 = arith.constant 0 : index
    %14 = vector.load %arg3[%c0_5, %c0_6] : memref<8x72xf32, #tpu.memory_space<vmem>>, vector<8x72xf32>
    %cst = arith.constant dense<0.000000e+00> : vector<8x460xf32>
    %15 = tpu.matmul %14, %13, %cst {dimension_numbers = #tpu.dot_dimension_numbers<[1], [0], [0], [1], [0, 0, 1, 1], [], []>} : vector<8x72xf32>, vector<72x460xf32>, vector<8x460xf32> -> vector<8x460xf32>
    %c0_7 = arith.constant 0 : index
    %c0_8 = arith.constant 0 : index
    %16 = vector.load %arg4[%c0_7, %c0_8] : memref<8x1xf32, #tpu.memory_space<vmem>>, vector<8x1xf32>
    %17 = vector.broadcast %16 : vector<8x1xf32> to vector<8x460xf32>
    %18 = arith.addf %15, %17 : vector<8x460xf32>
    %cst_9 = arith.constant 5.000000e-01 : f32
    %19 = vector.broadcast %cst_9 : f32 to vector<8x460xf32>
    %20 = arith.mulf %19, %18 : vector<8x460xf32>
    %cst_10 = arith.constant 0.707106769 : f32
    %21 = vector.broadcast %cst_10 : f32 to vector<8x460xf32>
    %22 = arith.mulf %18, %21 : vector<8x460xf32>
    %23 = math.erf %22 : vector<8x460xf32>
    %cst_11 = arith.constant 1.000000e+00 : f32
    %24 = vector.broadcast %cst_11 : f32 to vector<8x460xf32>
    %25 = arith.addf %24, %23 : vector<8x460xf32>
    %26 = arith.mulf %20, %25 : vector<8x460xf32>
    %27 = vector.extract_strided_slice %3 {offsets = [0, 19], sizes = [1, 460], strides = [1, 1]} : vector<1x512xf32> to vector<1x460xf32>
    %28 = vector.broadcast %27 : vector<1x460xf32> to vector<8x460xf32>
    %29 = arith.mulf %26, %28 : vector<8x460xf32>
    %30 = vector.extract_strided_slice %29 {offsets = [0, 0], sizes = [8, 422], strides = [1, 1]} : vector<8x460xf32> to vector<8x422xf32>
    %31 = vector.extract_strided_slice %29 {offsets = [0, 1], sizes = [8, 422], strides = [1, 1]} : vector<8x460xf32> to vector<8x422xf32>
    %32 = vector.extract_strided_slice %29 {offsets = [0, 2], sizes = [8, 422], strides = [1, 1]} : vector<8x460xf32> to vector<8x422xf32>
    %33 = vector.extract_strided_slice %29 {offsets = [0, 18], sizes = [8, 422], strides = [1, 1]} : vector<8x460xf32> to vector<8x422xf32>
    %34 = vector.extract_strided_slice %29 {offsets = [0, 19], sizes = [8, 422], strides = [1, 1]} : vector<8x460xf32> to vector<8x422xf32>
    %35 = vector.extract_strided_slice %29 {offsets = [0, 20], sizes = [8, 422], strides = [1, 1]} : vector<8x460xf32> to vector<8x422xf32>
    %36 = vector.extract_strided_slice %29 {offsets = [0, 36], sizes = [8, 422], strides = [1, 1]} : vector<8x460xf32> to vector<8x422xf32>
    %37 = vector.extract_strided_slice %29 {offsets = [0, 37], sizes = [8, 422], strides = [1, 1]} : vector<8x460xf32> to vector<8x422xf32>
    %38 = vector.extract_strided_slice %29 {offsets = [0, 38], sizes = [8, 422], strides = [1, 1]} : vector<8x460xf32> to vector<8x422xf32>
    %39 = tpu.concatenate %30, %31, %32, %33, %34, %35, %36, %37, %38 in 0 : vector<8x422xf32>, vector<8x422xf32>, vector<8x422xf32>, vector<8x422xf32>, vector<8x422xf32>, vector<8x422xf32>, vector<8x422xf32>, vector<8x422xf32>, vector<8x422xf32> -> vector<72x422xf32>
    %c0_12 = arith.constant 0 : index
    %c0_13 = arith.constant 0 : index
    %40 = vector.load %arg5[%c0_12, %c0_13] : memref<8x72xf32, #tpu.memory_space<vmem>>, vector<8x72xf32>
    %cst_14 = arith.constant dense<0.000000e+00> : vector<8x422xf32>
    %41 = tpu.matmul %40, %39, %cst_14 {dimension_numbers = #tpu.dot_dimension_numbers<[1], [0], [0], [1], [0, 0, 1, 1], [], []>} : vector<8x72xf32>, vector<72x422xf32>, vector<8x422xf32> -> vector<8x422xf32>
    %c0_15 = arith.constant 0 : index
    %c0_16 = arith.constant 0 : index
    %42 = vector.load %arg6[%c0_15, %c0_16] : memref<8x1xf32, #tpu.memory_space<vmem>>, vector<8x1xf32>
    %43 = vector.broadcast %42 : vector<8x1xf32> to vector<8x422xf32>
    %44 = arith.addf %41, %43 : vector<8x422xf32>
    %cst_17 = arith.constant 5.000000e-01 : f32
    %45 = vector.broadcast %cst_17 : f32 to vector<8x422xf32>
    %46 = arith.mulf %45, %44 : vector<8x422xf32>
    %cst_18 = arith.constant 0.707106769 : f32
    %47 = vector.broadcast %cst_18 : f32 to vector<8x422xf32>
    %48 = arith.mulf %44, %47 : vector<8x422xf32>
    %49 = math.erf %48 : vector<8x422xf32>
    %cst_19 = arith.constant 1.000000e+00 : f32
    %50 = vector.broadcast %cst_19 : f32 to vector<8x422xf32>
    %51 = arith.addf %50, %49 : vector<8x422xf32>
    %52 = arith.mulf %46, %51 : vector<8x422xf32>
    %53 = vector.extract_strided_slice %3 {offsets = [0, 38], sizes = [1, 422], strides = [1, 1]} : vector<1x512xf32> to vector<1x422xf32>
    %54 = vector.broadcast %53 : vector<1x422xf32> to vector<8x422xf32>
    %55 = arith.mulf %52, %54 : vector<8x422xf32>
    %56 = vector.extract_strided_slice %55 {offsets = [0, 0], sizes = [8, 384], strides = [1, 1]} : vector<8x422xf32> to vector<8x384xf32>
    %57 = vector.extract_strided_slice %55 {offsets = [0, 1], sizes = [8, 384], strides = [1, 1]} : vector<8x422xf32> to vector<8x384xf32>
    %58 = vector.extract_strided_slice %55 {offsets = [0, 2], sizes = [8, 384], strides = [1, 1]} : vector<8x422xf32> to vector<8x384xf32>
    %59 = vector.extract_strided_slice %55 {offsets = [0, 18], sizes = [8, 384], strides = [1, 1]} : vector<8x422xf32> to vector<8x384xf32>
    %60 = vector.extract_strided_slice %55 {offsets = [0, 19], sizes = [8, 384], strides = [1, 1]} : vector<8x422xf32> to vector<8x384xf32>
    %61 = vector.extract_strided_slice %55 {offsets = [0, 20], sizes = [8, 384], strides = [1, 1]} : vector<8x422xf32> to vector<8x384xf32>
    %62 = vector.extract_strided_slice %55 {offsets = [0, 36], sizes = [8, 384], strides = [1, 1]} : vector<8x422xf32> to vector<8x384xf32>
    %63 = vector.extract_strided_slice %55 {offsets = [0, 37], sizes = [8, 384], strides = [1, 1]} : vector<8x422xf32> to vector<8x384xf32>
    %64 = vector.extract_strided_slice %55 {offsets = [0, 38], sizes = [8, 384], strides = [1, 1]} : vector<8x422xf32> to vector<8x384xf32>
    %65 = tpu.concatenate %56, %57, %58, %59, %60, %61, %62, %63, %64 in 0 : vector<8x384xf32>, vector<8x384xf32>, vector<8x384xf32>, vector<8x384xf32>, vector<8x384xf32>, vector<8x384xf32>, vector<8x384xf32>, vector<8x384xf32>, vector<8x384xf32> -> vector<72x384xf32>
    %c0_20 = arith.constant 0 : index
    %c0_21 = arith.constant 0 : index
    %66 = vector.load %arg7[%c0_20, %c0_21] : memref<8x72xf32, #tpu.memory_space<vmem>>, vector<8x72xf32>
    %cst_22 = arith.constant dense<0.000000e+00> : vector<8x384xf32>
    %67 = tpu.matmul %66, %65, %cst_22 {dimension_numbers = #tpu.dot_dimension_numbers<[1], [0], [0], [1], [0, 0, 1, 1], [], []>} : vector<8x72xf32>, vector<72x384xf32>, vector<8x384xf32> -> vector<8x384xf32>
    %c0_23 = arith.constant 0 : index
    %c0_24 = arith.constant 0 : index
    %68 = vector.load %arg8[%c0_23, %c0_24] : memref<8x1xf32, #tpu.memory_space<vmem>>, vector<8x1xf32>
    %69 = vector.broadcast %68 : vector<8x1xf32> to vector<8x384xf32>
    %70 = arith.addf %67, %69 : vector<8x384xf32>
    %cst_25 = arith.constant 5.000000e-01 : f32
    %71 = vector.broadcast %cst_25 : f32 to vector<8x384xf32>
    %72 = arith.mulf %71, %70 : vector<8x384xf32>
    %cst_26 = arith.constant 0.707106769 : f32
    %73 = vector.broadcast %cst_26 : f32 to vector<8x384xf32>
    %74 = arith.mulf %70, %73 : vector<8x384xf32>
    %75 = math.erf %74 : vector<8x384xf32>
    %cst_27 = arith.constant 1.000000e+00 : f32
    %76 = vector.broadcast %cst_27 : f32 to vector<8x384xf32>
    %77 = arith.addf %76, %75 : vector<8x384xf32>
    %78 = arith.mulf %72, %77 : vector<8x384xf32>
    %79 = vector.extract_strided_slice %3 {offsets = [0, 57], sizes = [1, 384], strides = [1, 1]} : vector<1x512xf32> to vector<1x384xf32>
    %80 = vector.broadcast %79 : vector<1x384xf32> to vector<8x384xf32>
    %81 = arith.mulf %78, %80 : vector<8x384xf32>
    %c0_28 = arith.constant 0 : index
    %c0_29 = arith.constant 0 : index
    %82 = vector.load %arg9[%c0_28, %c0_29] : memref<8x384xf32, #tpu.memory_space<vmem>>, vector<8x384xf32>
    tpu.vector_store %arg9[%c0_28, %c0_29], %81 {strides = array<i32>} : memref<8x384xf32, #tpu.memory_space<vmem>>, vector<8x384xf32>,
    return
  }
  func.func @transform_0(%arg0: i32) -> (i32, i32, i32) {
    %c0_i32 = arith.constant 0 : i32
    %c0_i32_0 = arith.constant 0 : i32
    %c0_i32_1 = arith.constant 0 : i32
    return %arg0, %c0_i32, %c0_i32_0 : i32, i32, i32
  }
  func.func @transform_1(%arg0: i32) -> (i32, i32, i32) {
    %c0_i32 = arith.constant 0 : i32
    %c0_i32_0 = arith.constant 0 : i32
    %c0_i32_1 = arith.constant 0 : i32
    return %arg0, %c0_i32, %c0_i32_0 : i32, i32, i32
  }
  func.func @transform_2(%arg0: i32) -> (i32, i32) {
    %c0_i32 = arith.constant 0 : i32
    %c0_i32_0 = arith.constant 0 : i32
    %c0_i32_1 = arith.constant 0 : i32
    return %c0_i32, %c0_i32_0 : i32, i32
  }
  func.func @transform_3(%arg0: i32) -> (i32, i32) {
    %c0_i32 = arith.constant 0 : i32
    %c0_i32_0 = arith.constant 0 : i32
    %c0_i32_1 = arith.constant 0 : i32
    return %c0_i32, %c0_i32_0 : i32, i32
  }
  func.func @transform_4(%arg0: i32) -> (i32, i32) {
    %c0_i32 = arith.constant 0 : i32
    %c0_i32_0 = arith.constant 0 : i32
    %c0_i32_1 = arith.constant 0 : i32
    return %c0_i32, %c0_i32_0 : i32, i32
  }
  func.func @transform_5(%arg0: i32) -> (i32, i32) {
    %c0_i32 = arith.constant 0 : i32
    %c0_i32_0 = arith.constant 0 : i32
    %c0_i32_1 = arith.constant 0 : i32
    return %c0_i32, %c0_i32_0 : i32, i32
  }
  func.func @transform_6(%arg0: i32) -> (i32, i32) {
    %c0_i32 = arith.constant 0 : i32
    %c0_i32_0 = arith.constant 0 : i32
    %c0_i32_1 = arith.constant 0 : i32
    return %c0_i32, %c0_i32_0 : i32, i32
  }
  func.func @transform_7(%arg0: i32) -> (i32, i32) {
    %c0_i32 = arith.constant 0 : i32
    %c0_i32_0 = arith.constant 0 : i32
    %c0_i32_1 = arith.constant 0 : i32
    return %c0_i32, %c0_i32_0 : i32, i32
  }
  func.func @transform_8(%arg0: i32) -> (i32, i32) {
    %c0_i32 = arith.constant 0 : i32
    %c0_i32_0 = arith.constant 0 : i32
    return %c0_i32, %arg0 : i32, i32
  }
}

</mosaic_0001>

<bundles_post_ra>
// kernel: tpu_custom_call.1
= control target key start
LH: loop header
LB: loop body
LE: loop exit
PB: predicated region body
PF: predicated region fallthrough
CT: control target
= control target key end

     0   :  { %s2916_s0 = inlined_call_operand.hbm [shape: f32[2,8,512], index: 0, kind: input, shape index: {}]   ;;  %s2917_s1 = inlined_call_operand.vmem [shape: f32[2,1,512], index: 1, kind: input, shape index: {}]   ;;  %s2918_s2 = inlined_call_operand.vmem [shape: f32[8,72], index: 2, kind: input, shape index: {}]   ;;  %s2919_s3 = inlined_call_operand.vmem [shape: f32[8,1], index: 3, kind: input, shape index: {}]   ;;  %s2920_s4 = inlined_call_operand.vmem [shape: f32[8,72], index: 4, kind: input, shape index: {}]   ;;  %s2921_s5 = inlined_call_operand.vmem [shape: f32[8,1], index: 5, kind: input, shape index: {}]   ;;  %s2922_s6 = inlined_call_operand.hbm [shape: f32[8,72], index: 6, kind: input, shape index: {}]   ;;  %s2923_s7 = inlined_call_operand.vmem [shape: f32[8,1], index: 7, kind: input, shape index: {}]   ;;  %s2924_s8 = inlined_call_operand.hbm [shape: f32[8,768], index: 8, kind: output, shape index: {}]  }
   0x1   :  { %2926 = sst [smem:[#allocation12_spill]] %s2922_s6 }
   0x2   :  { %13 = vsyncpa [#allocation3], 0 }
   0x3   :  { %15 = vsyncpa [#allocation3 + $0x1], 0 }
   0x4   :  { %16 = vsyncpa [#allocation6], 0 }
   0x5   :  { %17 = vsyncpa [#allocation4], 0 }
   0x6   :  { %19 = vsyncpa [#allocation4 + $0x1], 0  ;;  %s2200_s27 = smov 0   ;;  %s2202_s28 = smov 0  }
   0x7   :  { %s2204_s29 = smov 0   ;;  %s2206_s30 = smov 0  }
   0x8 LB: > { %s2221_s9 = sadd.s32 4294967295, %s2142_s30   ;;  %s1642_s10 = sadd.s32 4294967294, %s2142_s30   ;;  %s2142_s30 = sphi %s2206_s30, %s2954_s30   ;;  %s2138_s29 = sphi %s2204_s29, %s2953_s29   ;;  %s2134_s28 = sphi %s2202_s28, %s2952_s28   ;;  %s2130_s27 = sphi %s2200_s27, %s2951_s27  }
   0x9   : > { %p45_p0 = scmp.ne.s32.totalorder %s2134_s28, %s2130_s27  ;;  %p46_p1 = scmp.eq.s32.totalorder %s2221_s9, 0 }
   0xa   : > { %p221_p2 = scmp.eq.s32.totalorder %s2221_s9, 1  ;;  %p227_p3 = scmp.eq.s32.totalorder %s1642_s10, 1 }
   0xb   : > { %p2230_p4 = por %p46_p1, %p45_p0  ;;  %p1643_p5 = scmp.ge.s32.totalorder %s2142_s30, 1 }
   0xc   : > { %p2235_p6 = por %p227_p3, %p45_p0  ;;  %p234_p7 = scmp.lt.s32.totalorder %s2142_s30, 3 }
   0xd   : > { %s2929_s6 = sld [smem:[#allocation12_spill]]  ;;  %s2144_s17 = smov [#allocation5]  }
   0xe   : > { %p2243_p8 = pnand %p1643_p5, %p234_p7  ;;  %s260_s18 = sshll.u32 %s2144_s17, 4  ;;  %s261_s18 = int_to_ptr.vmem [resolvable:$true] %s260_s18 }
   0xf   : > { %s2253_s19 = sadd.s32 1, %s2142_s30   ;;  %s32_s20 = sadd.s32 1, %s2138_s29 }
  0x10   : > { %p1689_p10 = pneg %p2243_p8  ;;  %s29_s21 = ssub.s32 %s2142_s30, %s2253_s19 }
  0x11   : > { %p30_p12 = scmp.eq.s32.totalorder %s29_s21, 0  ;;  %p39_p13 = scmp.ne.s32.totalorder %s2138_s29, %s2134_s28 }
  0x12   : > { %p1690_p11 = pnand %p1689_p10, %p46_p1  ;;  %p40_p0 = scmp.eq.s32.totalorder %s2142_s30, 0 }
  0x13   : > { %s258_s15 = sshll.u32 %s2929_s6, 4  ;;  %p2266_p3 = por %p221_p2, %p39_p13  ;;  %s259_s15 = int_to_ptr.hbm [resolvable:$true] %s258_s15 }
  0x14   : > { %1692 = dma.hbm_to_vmem [thread:$0]  (!%p1690_p11), %s259_s15, 128, %s261_s18, [#allocation6]  }
  0x15   : > { %s2262_s22 = scalar_select %p30_p12, %s2138_s29, %s32_s20  }
  0x16   : > { %p1702_p5 = scmp.lt.s32.totalorder %s2142_s30, 2  ;;  %s274_s24 = sand.u32 1, %s2138_s29  }
  0x17   : > { %2931 = sst [smem:[#allocation11_spill]] %s2262_s22  ;;  %s1678_s25 = sshll.u32 %s2142_s30, 5 }
  0x18   : > { %p41_p7 = por %p40_p0, %p39_p13  ;;  %s1646_s26 = sshll.u32 %s274_s24, 5 }
  0x19   : > { %s283_s14 = scalar_lea.hbm %s2916_s0, %s1678_s25  ;;  %s278_s17 = scalar_lea.vmem [#allocation2], %s1646_s26 }
  0x1a   : > { %s285_s15 = sshll.u32 %s283_s14, 4  ;;  %s287_s18 = sshll.u32 %s278_s17, 4  ;;  %s286_s15 = int_to_ptr.hbm [resolvable:$true] %s285_s15  ;;  %s288_s18 = int_to_ptr.vmem [resolvable:$true] %s287_s18 }
  0x1b   : > { %p2276_p10 = pnand %p1702_p5, %p41_p7  ;;  %s275_s21 = scalar_lea.sflag [#allocation3], %s274_s24 }
  0x1c   : > { %s2042_s6 = sshra.s32 %s286_s15, 4  ;;  %s2049_s26 = scalar_lea.hbm %s2916_s0, 64  ;;  %s2043_s6 = int_to_ptr.hbm [resolvable:$true] %s2042_s6 }
  0x1d   : > { %s2044_s22 = scalar_lea.hbm %s2043_s6, 32  ;;  %p2046_p11 = pneg %p2276_p10 }
  0x1e   : > { %p2045_p2 = scmp.ne.s32.totalorder %s2043_s6, %s2044_s22  ;;  %p2050_p0 = scmp.lt.s32.totalorder %s2043_s6, %s2916_s0 }
  0x1f   : > { %p2051_p5 = scmp.lt.s32.totalorder %s2049_s26, %s2044_s22 }
  0x20   : > { %p2047_p12 = pnand %p2046_p11, %p2045_p2 }
  0x21   : > { %p2052_p7 = por %p2051_p5, %p2050_p0 }
  0x22   : > { %p2048_p13 = pneg %p2047_p12 }
  0x24   : > { %p2053_p9 = pnand %p2052_p7, %p2048_p13 }
  0x26   : > { %2056 = shalt.err (!%p2053_p9)
}
  0x27   : > { %1696 = dma.hbm_to_vmem [thread:$0]  (!%p2276_p10), %s286_s15, 512, %s288_s18, %s275_s21  }
  0x28   : > { %303 = sbr.rel (%p2243_p8) target bundleno = 1088 (0x440), region = 52  ;;  %s2293_s24 = sand.u32 (!%p2243_p8), 1, %s2134_s28  }
  0x29   : > { %s1650_s17 = sshll.u32 (!%p2243_p8), %s2293_s24, 5  ;;  %s306_s25 = scalar_lea.sflag (!%p2243_p8), [#allocation3], %s2293_s24 }
  0x2a   : > { %s309_s10 = scalar_lea.vmem (!%p2243_p8), [#allocation2], %s1650_s17 }
  0x2d   : > { %2117 = dma.done.wait (%p2230_p4), %s306_s25, 512  }
  0x2e   : > { %2119 = vsyncadd (%p2230_p4), %s306_s25, 4294966784 }
  0x2f   : > { %2121 = dma.done.wait (%p46_p1), [#allocation6], 128  }
  0x30   : > { %2123 = vsyncadd (%p46_p1), [#allocation6], 4294967168  ;;  %v2305_v0 = vld [vmem:[%s309_s10 + $0x10] sm:$0xff]  ;;  %v2307_v1 = vld [vmem:[%s309_s10 + $0x18] sm:$0xff]  ;;  %s2145_s6 = smov 92   ;;  %s2146_s16 = smov 90  }
  0x31   : > { %v1758_v2 = vpack.i.bf16 %v2307_v1, %v2305_v0  ;;  %s2147_s11 = smov 109   ;;  %s2148_s22 = smov 108   ;;  %v2317_v3 = vld [vmem:[%s309_s10] sm:$0xff]  ;;  %v2319_v4 = vld [vmem:[%s309_s10 + $0x8] sm:$0xff]  ;;  %vm486_vm0 = vcmask 736256   ;;  %vm470_vm1 = vcmask 744448  }
  0x32   : > { %s2149_s15 = smov 91   ;;  %s2150_s18 = smov 110   ;;  %v1788_v5 = vpack.i.bf16 %v2319_v4, %v2317_v3  ;;  %v495_v26 = vld [vmem:[%s2919_s3] sm:$0xff]  ;;  %vm454_vm2 = vcmask 752640   ;;  %vm438_vm3 = vcmask 883712   ;;  %v2153_v30 = vmov 0  }
  0x33   : > { %1759 = vrot.lane.b32.xlu1 %v1758_v2, %s2145_s6  ;;  %1749 = vrot.lane.b32.xlu0 %v1758_v2, %s2146_s16  ;;  %s2151_s20 = smov 127   ;;  %s2152_s21 = smov 126   ;;  %vm422_vm4 = vcmask 891904   ;;  %vm406_vm5 = vcmask 900096   ;;  %vm390_vm6 = vcmask 1031168   ;;  %vm374_vm7 = vcmask 1039360  }
  0x34   : > { %1769 = vrot.lane.b32.xlu2 %v1758_v2, %s2147_s11  ;;  %p352_p1 = scmp.lt.s32.totalorder %s2221_s9, 1  ;;  %1828 = vset.pattern.permute.xlu1 %v2153_v30  ;;  %v494_v50 = vld [vmem:[%s2918_s2] sm:$0xff]  ;;  %vm2925_vm8 = vcmask 588800   ;;  %s2092_s13 = scalar_lea.hbm %s2924_s8, 48 }
  0x35   : > { %1989 = vset.pattern.permute.xlu0 %v2153_v30 }
  0x36   : > { %s353_s26 = scalar_select %p352_p1, %s2221_s9, 1 }
  0x38   : > { %s1652_s17 = sshll.u32 %s353_s26, 2 }
  0x39   : > { %s355_s26 = scalar_lea.vmem %s2917_s1, %s1652_s17  ;;  %s1534_s17 = scalar_lea.sflag [#allocation4], %s2293_s24 }
  0x3a   : > { %v361_v36 = vld [vmem:[%s355_s26] sm:$0xf] }
  0x3b   : > { %1764 = vrot.lane.b32.xlu1 %v1758_v2, %s2148_s22  ;;  %1754 = vrot.lane.b32.xlu0 %v1758_v2, %s2149_s15  ;;  %v2380_v39 = vperm.slane %v361_v36, 3  ;;  %v2382_v40 = vperm.slane %v361_v36, 0  ;;  %v2384_v41 = vperm.slane %v361_v36, 2  ;;  %v2408_v54 = vperm.slane %v361_v36, 1 }
  0x3c   : > { %1774 = vrot.lane.b32.xlu2 %v1758_v2, %s2150_s18 }
  0x43   : > { %1784 = vrot.lane.b32.xlu1 %v1758_v2, %s2151_s20  ;;  %1779 = vrot.lane.b32.xlu0 %v1758_v2, %s2152_s21 }
  0x44   : > { %1789 = vrot.lane.b32.xlu2 %v1788_v5, %s2146_s16 }
  0x4b   : > { %1799 = vrot.lane.b32.xlu1 %v1788_v5, %s2145_s6  ;;  %1794 = vrot.lane.b32.xlu0 %v1788_v5, %s2149_s15 }
  0x4c   : > { %1804 = vrot.lane.b32.xlu2 %v1788_v5, %s2148_s22 }
  0x53   : > { %1814 = vrot.lane.b32.xlu1 %v1788_v5, %s2150_s18  ;;  %1809 = vrot.lane.b32.xlu0 %v1788_v5, %s2147_s11 }
  0x54   : > { %1819 = vrot.lane.b32.xlu2 %v1788_v5, %s2152_s21 }
  0x5b   : > { %1824 = vrot.lane.b32.xlu0 %v1788_v5, %s2151_s20  ;;  %498 = vperm.xlu1 %1828, %v495_v26  }
  0x5c   : > { %770 = vrot.lane.b32.xlu2 %v2384_v41, %s2147_s11 }
  0x63   : > { %772 = vrot.lane.b32.xlu0 %v2380_v39, %s2147_s11  ;;  %766 = vrot.lane.b32.xlu1 %v2382_v40, %s2147_s11 }
  0x64   : > { %768 = vrot.lane.b32.xlu2 %v2408_v54, %s2147_s11 }
  0x8e   : > { %v2333_v6 = vpop.permute.xlu2 %1769 }
  0x8f   : > { %v1771_v27 = vunpack.i.l.bf16 %v2333_v6  ;;  %v1772_v29 = vunpack.i.h.bf16 %v2333_v6 }
  0x91   : > { %v425_v34 = vsel %vm422_vm4, %v1771_v27, %v1772_v29 }
  0x96   : > { %v2335_v7 = vpop.permute.xlu2 %1774 }
  0x97   : > { %v1776_v33 = vunpack.i.l.bf16 %v2335_v7  ;;  %v1777_v35 = vunpack.i.h.bf16 %v2335_v7 }
  0x99   : > { %v409_v46 = vsel %vm406_vm5, %v1776_v33, %v1777_v35 }
  0x9e   : > { %v1790_v8 = vpop.permute.xlu2 %1789 }
  0x9f   : > { %v1792_v9 = vunpack.i.h.bf16 %v1790_v8  ;;  %v1791_v10 = vunpack.i.l.bf16 %v1790_v8 }
  0xa1   : > { %v487_v11 = vsel %vm486_vm0, %v1791_v10, %v1792_v9 }
  0xa2   : > { %512 = vmatpush.msra.mxu0 %v487_v11 }
  0xa5   : > { %v2338_v12 = vpop.permute.xlu1 %1759  ;;  %v1750_v13 = vpop.permute.xlu0 %1749 }
  0xa6   : > { %v1751_v14 = vunpack.i.l.bf16 %v1750_v13  ;;  %v1752_v15 = vunpack.i.h.bf16 %v1750_v13  ;;  %v1761_v18 = vunpack.i.l.bf16 %v2338_v12  ;;  %v1762_v21 = vunpack.i.h.bf16 %v2338_v12  ;;  %v1805_v47 = vpop.permute.xlu2 %1804 }
  0xa7   : > { %v1806_v51 = vunpack.i.l.bf16 %v1805_v47  ;;  %v1807_v59 = vunpack.i.h.bf16 %v1805_v47 }
  0xa8   : > { %572 = vmatpush.msra.mxu3 %v1752_v15  ;;  %v488_v16 = vsel %vm486_vm0, %v1792_v9, %v1751_v14  ;;  %v489_v17 = vsel %vm486_vm0, %v1751_v14, %v1752_v15  ;;  %v457_v31 = vsel %vm454_vm2, %v1761_v18, %v1762_v21 }
  0xa9   : > { %532 = vmatpush.msra.mxu1 %v488_v16  ;;  %552 = vmatpush.msra.mxu2 %v489_v17 }
  0xad   : > { %v2345_v19 = vpop.permute.xlu1 %1764  ;;  %v2347_v20 = vpop.permute.xlu0 %1754 }
  0xae   : > { %v1766_v22 = vunpack.i.l.bf16 %v2345_v19  ;;  %v1756_v23 = vunpack.i.l.bf16 %v2347_v20  ;;  %v1757_v24 = vunpack.i.h.bf16 %v2347_v20  ;;  %v1767_v25 = vunpack.i.h.bf16 %v2345_v19 }
  0xb0   : > { %573 = vmatpush.msra.mxu3 %v1757_v24  ;;  %v473_v28 = vsel %vm470_vm1, %v1756_v23, %v1757_v24  ;;  %v441_v32 = vsel %vm438_vm3, %v1766_v22, %v1767_v25  ;;  %v440_v2 = vsel %vm438_vm3, %v1807_v59, %v1766_v22 }
  0xb1   : > { %553 = vmatpush.msra.mxu2 %v473_v28 }
  0xb2   : > { %574 = vmatpush.msra.mxu3 %v1762_v21 }
  0xb3   : > { %554 = vmatpush.msra.mxu2 %v457_v31 }
  0xb4   : > { %575 = vmatpush.msra.mxu3 %v1767_v25 }
  0xb5   : > { %v2376_v37 = vpop.permute.xlu1 %1784  ;;  %v2378_v38 = vpop.permute.xlu0 %1779  ;;  %555 = vmatpush.msra.mxu2 %v441_v32 }
  0xb6   : > { %v1786_v42 = vunpack.i.l.bf16 %v2376_v37  ;;  %v1781_v43 = vunpack.i.l.bf16 %v2378_v38  ;;  %576 = vmatpush.msra.mxu3 %v1772_v29  ;;  %v1782_v44 = vunpack.i.h.bf16 %v2378_v38  ;;  %v1787_v45 = vunpack.i.h.bf16 %v2376_v37 }
  0xb7   : > { %556 = vmatpush.msra.mxu2 %v425_v34 }
  0xb8   : > { %577 = vmatpush.msra.mxu3 %v1777_v35  ;;  %v393_v48 = vsel %vm390_vm6, %v1781_v43, %v1782_v44  ;;  %v377_v49 = vsel %vm374_vm7, %v1786_v42, %v1787_v45 }
  0xb9   : > { %557 = vmatpush.msra.mxu2 %v409_v46 }
  0xba   : > { %578 = vmatpush.msra.mxu3 %v1782_v44 }
  0xbb   : > { %558 = vmatpush.msra.mxu2 %v393_v48 }
  0xbc   : > { %579 = vmatpush.msra.mxu3 %v1787_v45 }
  0xbd   : > { %559 = vmatpush.msra.mxu2 %v377_v49  ;;  %v1800_v52 = vpop.permute.xlu1 %1799  ;;  %v1795_v53 = vpop.permute.xlu0 %1794 }
  0xbe   : > { %v1802_v55 = vunpack.i.h.bf16 %v1800_v52  ;;  %v1801_v56 = vunpack.i.l.bf16 %v1800_v52  ;;  %v1797_v57 = vunpack.i.h.bf16 %v1795_v53  ;;  %v1796_v58 = vunpack.i.l.bf16 %v1795_v53  ;;  %580 = vmatpush.msra.mxu3 %v2307_v1  ;;  %v1820_v1 = vpop.permute.xlu2 %1819 }
  0xbf   : > { %560 = vmatpush.msra.mxu2 %v2305_v0  ;;  %1656 = vmatmul.msk.f32.vlgmr.msra.gmra.mxu3 %vm2925_vm8, %v494_v50  ;;  %v439_v0 = vsel %vm438_vm3, %v1806_v51, %v1807_v59  ;;  %v1821_v5 = vunpack.i.l.bf16 %v1820_v1  ;;  %v1822_v14 = vunpack.i.h.bf16 %v1820_v1 }
  0xc0   : > { %1655 = vmatmul.msk.f32.vlgmr.msra.gmra.mxu2 %vm2925_vm8, %v494_v50  ;;  %v471_v60 = vsel %vm470_vm1, %v1796_v58, %v1797_v57  ;;  %v472_v61 = vsel %vm470_vm1, %v1797_v57, %v1756_v23  ;;  %v455_v62 = vsel %vm454_vm2, %v1801_v56, %v1802_v55  ;;  %v456_v63 = vsel %vm454_vm2, %v1802_v55, %v1761_v18 }
  0xc1   : > { %513 = vmatpush.msra.mxu0 %v471_v60  ;;  %533 = vmatpush.msra.mxu1 %v472_v61  ;;  %v391_v19 = vsel %vm390_vm6, %v1821_v5, %v1822_v14  ;;  %v392_v20 = vsel %vm390_vm6, %v1822_v14, %v1781_v43 }
  0xc3   : > { %534 = vmatpush.msra.mxu1 %v456_v63  ;;  %514 = vmatpush.msra.mxu0 %v455_v62 }
  0xc5   : > { %v1815_v8 = vpop.permute.xlu1 %1814  ;;  %v1810_v9 = vpop.permute.xlu0 %1809  ;;  %535 = vmatpush.msra.mxu1 %v440_v2  ;;  %515 = vmatpush.msra.mxu0 %v439_v0 }
  0xc6   : > { %v1817_v10 = vunpack.i.h.bf16 %v1815_v8  ;;  %v1816_v11 = vunpack.i.l.bf16 %v1815_v8  ;;  %v1812_v12 = vunpack.i.h.bf16 %v1810_v9  ;;  %v1811_v13 = vunpack.i.l.bf16 %v1810_v9 }
  0xc8   : > { %v423_v15 = vsel %vm422_vm4, %v1811_v13, %v1812_v12  ;;  %v424_v16 = vsel %vm422_vm4, %v1812_v12, %v1771_v27  ;;  %v407_v17 = vsel %vm406_vm5, %v1816_v11, %v1817_v10  ;;  %v408_v18 = vsel %vm406_vm5, %v1817_v10, %v1776_v33 }
  0xc9   : > { %516 = vmatpush.msra.mxu0 %v423_v15  ;;  %536 = vmatpush.msra.mxu1 %v424_v16 }
  0xcb   : > { %537 = vmatpush.msra.mxu1 %v408_v18  ;;  %517 = vmatpush.msra.mxu0 %v407_v17 }
  0xcd   : > { %v1825_v21 = vpop.permute.xlu0 %1824  ;;  %538 = vmatpush.msra.mxu1 %v392_v20  ;;  %518 = vmatpush.msra.mxu0 %v391_v19  ;;  %v499_v24 = vpop.permute.xlu1 %498 }
  0xce   : > { %v1827_v6 = vunpack.i.h.bf16 %v1825_v21  ;;  %v1826_v22 = vunpack.i.l.bf16 %v1825_v21 }
  0xd0   : > { %v375_v23 = vsel %vm374_vm7, %v1826_v22, %v1827_v6  ;;  %v376_v7 = vsel %vm374_vm7, %v1827_v6, %v1786_v42 }
  0xd1   : > { %519 = vmatpush.msra.mxu0 %v375_v23  ;;  %539 = vmatpush.msra.mxu1 %v376_v7 }
  0xd3   : > { %520 = vmatpush.msra.mxu0 %v2317_v3  ;;  %540 = vmatpush.msra.mxu1 %v2319_v4 }
  0xd4   : > { %1653 = vmatmul.msk.f32.vlgmr.msra.gmra.mxu0 %vm2925_vm8, %v494_v50  ;;  %1654 = vmatmul.msk.f32.vlgmr.msra.gmra.mxu1 %vm2925_vm8, %v494_v50 }
 0x142   : > { %v582_v25 = vpop.f32.mrf.mxu3 }
 0x143   : > { %v2448_v26 = vadd.f32 %v582_v25, %v499_v24  ;;  %v562_v27 = vpop.f32.mrf.mxu2 }
 0x144   : > { %v2450_v28 = vadd.f32 %v562_v27, %v499_v24 }
 0x145   : > { %v2453_v29 = vmul.f32 0.70710677, %v2448_v26 }
 0x146   : > { %v2456_v30 = vmul.f32 0.70710677, %v2450_v28 }
 0x147   : > { %v713_v3 = vmul.f32 %v2453_v29, %v2453_v29 }
 0x148   : > { %v673_v4 = vmul.f32 %v2456_v30, %v2456_v30 }
 0x149   : > { %v2462_v31 = vmin.f32 %v713_v3, 16.0 }
 0x14a   : > { %v2464_v32 = vmin.f32 %v673_v4, 16.0 }
 0x14b   : > { %v715_v33 = vmul.f32 2.1237322e-06, %v2462_v31  ;;  %v726_v34 = vmul.f32 3.8918573e-05, %v2462_v31 }
 0x14c   : > { %v675_v35 = vmul.f32 2.1237322e-06, %v2464_v32  ;;  %v686_v36 = vmul.f32 3.8918573e-05, %v2464_v32 }
 0x14d   : > { %v727_v37 = vadd.f32 0.001143296, %v726_v34  ;;  %v716_v43 = vadd.f32 0.00028619796, %v715_v33 }
 0x14e   : > { %v676_v38 = vadd.f32 0.00028619796, %v675_v35  ;;  %v687_v42 = vadd.f32 0.001143296, %v686_v36 }
 0x14f   : > { %v728_v44 = vmul.f32 %v727_v37, %v2462_v31  ;;  %v717_v55 = vmul.f32 %v716_v43, %v2462_v31 }
 0x150   : > { %v677_v45 = vmul.f32 %v676_v38, %v2464_v32  ;;  %v688_v46 = vmul.f32 %v687_v42, %v2464_v32 }
 0x151   : > { %v522_v47 = vpop.f32.mrf.mxu0  ;;  %v542_v48 = vpop.f32.mrf.mxu1  ;;  %v729_v49 = vadd.f32 0.014752088, %v728_v44  ;;  %v718_v1 = vadd.f32 0.0036580483, %v717_v55 }
 0x152   : > { %v678_v50 = vadd.f32 0.0036580483, %v677_v45  ;;  %v689_v51 = vadd.f32 0.014752088, %v688_v46  ;;  %v2473_v52 = vadd.f32 %v522_v47, %v499_v24  ;;  %v2475_v53 = vadd.f32 %v542_v48, %v499_v24 }
 0x153   : > { %v730_v56 = vmul.f32 %v729_v49, %v2462_v31  ;;  %v719_v16 = vmul.f32 %v718_v1, %v2462_v31 }
 0x154   : > { %v679_v57 = vmul.f32 %v678_v50, %v2464_v32  ;;  %v690_v58 = vmul.f32 %v689_v51, %v2464_v32  ;;  %v2482_v59 = vmul.f32 0.70710677, %v2473_v52  ;;  %v2485_v60 = vmul.f32 0.70710677, %v2475_v53 }
 0x155   : > { %v731_v63 = vadd.f32 0.112945676, %v730_v56  ;;  %v720_v33 = vadd.f32 0.05243302, %v719_v16 }
 0x156   : > { %v691_v61 = vadd.f32 0.112945676, %v690_v58  ;;  %v593_v62 = vmul.f32 %v2482_v59, %v2482_v59  ;;  %v633_v0 = vmul.f32 %v2485_v60, %v2485_v60  ;;  %v680_v2 = vadd.f32 0.05243302, %v679_v57 }
 0x157   : > { %v732_v9 = vmul.f32 %v731_v63, %v2462_v31  ;;  %v721_v45 = vmul.f32 %v720_v33, %v2462_v31 }
 0x158   : > { %v692_v5 = vmul.f32 %v691_v61, %v2464_v32  ;;  %v2492_v8 = vmin.f32 %v593_v62, 16.0  ;;  %v2495_v10 = vmin.f32 %v633_v0, 16.0  ;;  %v681_v17 = vmul.f32 %v680_v2, %v2464_v32 }
 0x159   : > { %v733_v20 = vadd.f32 0.4994258, %v732_v9  ;;  %v722_v58 = vadd.f32 0.18741608, %v721_v45 }
 0x15a   : > { %v693_v11 = vadd.f32 0.4994258, %v692_v5  ;;  %v595_v12 = vmul.f32 2.1237322e-06, %v2492_v8  ;;  %v606_v13 = vmul.f32 3.8918573e-05, %v2492_v8 }
 0x15b   : > { %v635_v14 = vmul.f32 2.1237322e-06, %v2495_v10  ;;  %v646_v15 = vmul.f32 3.8918573e-05, %v2495_v10  ;;  %v734_v3 = vmul.f32 %v733_v20, %v2462_v31  ;;  %v682_v4 = vadd.f32 0.18741608, %v681_v17 }
 0x15c   : > { %v694_v18 = vmul.f32 %v693_v11, %v2464_v32  ;;  %v596_v19 = vadd.f32 0.00028619796, %v595_v12  ;;  %v607_v21 = vadd.f32 0.001143296, %v606_v13 }
 0x15d   : > { %v636_v6 = vadd.f32 0.00028619796, %v635_v14  ;;  %v647_v22 = vadd.f32 0.001143296, %v646_v15  ;;  %v2509_v38 = vadd.f32 1.0, %v734_v3  ;;  %v683_v43 = vmul.f32 %v682_v4, %v2464_v32 }
 0x15e   : > { %v695_v23 = vadd.f32 1.0, %v694_v18  ;;  %v597_v7 = vmul.f32 %v596_v19, %v2492_v8  ;;  %v608_v24 = vmul.f32 %v607_v21, %v2492_v8  ;;  %v723_v14 = vmul.f32 %v722_v58, %v2462_v31 }
 0x15f   : > { %v637_v25 = vmul.f32 %v636_v6, %v2495_v10  ;;  %v648_v27 = vmul.f32 %v647_v22, %v2495_v10  ;;  %v684_v56 = vadd.f32 1.1283791, %v683_v43  ;;  %vm741_vm14 = vweird.f32 %v2509_v38 }
 0x160   : > { %1990 = vrcp.f32 %v695_v23  ;;  %v598_v34 = vadd.f32 0.0036580483, %v597_v7  ;;  %v609_v35 = vadd.f32 0.014752088, %v608_v24  ;;  %v705_v57 = vand.u32 2147483647, %v695_v23 }
 0x161   : > { %v638_v36 = vadd.f32 0.0036580483, %v637_v25  ;;  %v649_v37 = vadd.f32 0.014752088, %v648_v27  ;;  %1992 = vrcp.f32 %v2509_v38  ;;  %v707_v1 = vand.u32 2147483648, %v695_v23 }
 0x162   : > { %v610_v42 = vmul.f32 %v609_v35, %v2492_v8  ;;  %v599_v46 = vmul.f32 %v598_v34, %v2492_v8  ;;  %vm701_vm10 = vweird.f32 %v695_v23  ;;  %v685_v18 = vmul.f32 %v684_v56, %v2456_v30 }
 0x163   : > { %v650_v44 = vmul.f32 %v649_v37, %v2495_v10  ;;  %v639_v49 = vmul.f32 %v638_v36, %v2495_v10  ;;  %v708_v19 = vor.u32 1.1754944e-38, %v707_v1  ;;  %vm706_vm12 = vcmp.eq.f32.partialorder %v705_v57, 8.507059e+37 }
 0x164   : > { %v611_v47 = vadd.f32 0.112945676, %v610_v42  ;;  %v600_v62 = vadd.f32 0.05243302, %v599_v46  ;;  %v724_v24 = vadd.f32 1.1283791, %v723_v14  ;;  %v773_v42 = vpop.permute.xlu0 %772 }
 0x165   : > { %v651_v50 = vadd.f32 0.112945676, %v650_v44  ;;  %v640_v2 = vadd.f32 0.05243302, %v639_v49  ;;  %v745_v30 = vand.u32 2147483647, %v2509_v38  ;;  %v771_v49 = vpop.permute.xlu2 %770 }
 0x166   : > { %v1991_v48 = vpop.eup %1990  ;;  %v612_v55 = vmul.f32 %v611_v47, %v2492_v8  ;;  %v601_v16 = vmul.f32 %v600_v62, %v2492_v8  ;;  %v725_v36 = vmul.f32 %v724_v24, %v2453_v29  ;;  %v587_v47 = vmul.f32 0.5, %v2450_v28 }
 0x167   : > { %v697_v51 = vmul.f32 %v1991_v48, %v695_v23  ;;  %v652_v32 = vmul.f32 %v651_v50, %v2495_v10  ;;  %v1993_v0 = vpop.eup %1992  ;;  %vm702_vm9 = vweird.f32 %v1991_v48  ;;  %v641_v22 = vmul.f32 %v640_v2, %v2495_v10 }
 0x168   : > { %v613_v63 = vadd.f32 0.4994258, %v612_v55  ;;  %v737_v12 = vmul.f32 %v1993_v0, %v2509_v38  ;;  %vm703_vm11 = vmor %vm701_vm10, %vm702_vm9  ;;  %v602_v25 = vadd.f32 0.18741608, %v601_v16  ;;  %v747_v23 = vand.u32 2147483648, %v2509_v38 }
 0x169   : > { %v698_v61 = vsub.f32 1.0, %v697_v51  ;;  %v653_v5 = vadd.f32 0.4994258, %v652_v32  ;;  %vm742_vm13 = vweird.f32 %v1993_v0  ;;  %v642_v4 = vadd.f32 0.18741608, %v641_v22 }
 0x16a   : > { %v614_v11 = vmul.f32 %v613_v63, %v2492_v8  ;;  %v738_v21 = vsub.f32 1.0, %v737_v12  ;;  %v603_v35 = vmul.f32 %v602_v25, %v2492_v8  ;;  %vm743_vm15 = vmor %vm741_vm14, %vm742_vm13  ;;  %v748_v37 = vor.u32 1.1754944e-38, %v747_v23 }
 0x16b   : > { %v699_v9 = vmul.f32 %v1991_v48, %v698_v61  ;;  %v654_v13 = vmul.f32 %v653_v5, %v2495_v10  ;;  %vm746_vm9 = vcmp.eq.f32.partialorder %v745_v30, 8.507059e+37  ;;  %v588_v38 = vmul.f32 0.5, %v2448_v26 }
 0x16c   : > { %v615_v17 = vadd.f32 1.0, %v614_v11  ;;  %v739_v27 = vmul.f32 %v1993_v0, %v738_v21  ;;  %v776_v55 = vsel %vm422_vm4, %v771_v49, %v773_v42  ;;  %v604_v56 = vadd.f32 1.1283791, %v603_v35 }
 0x16d   : > { %v700_v15 = vadd.f32 %v1991_v48, %v699_v9  ;;  %v2526_v20 = vadd.f32 1.0, %v654_v13  ;;  %v585_v24 = vmul.f32 0.5, %v2473_v52  ;;  %v586_v30 = vmul.f32 0.5, %v2475_v53  ;;  %v910_v53 = vld [vmem:[%s2921_s5] sm:$0xff] }
 0x16e   : > { %1994 = vrcp.f32 %v615_v17  ;;  %v740_v33 = vadd.f32 %v1993_v0, %v739_v27  ;;  %v625_v57 = vand.u32 2147483647, %v615_v17  ;;  %v627_v32 = vand.u32 2147483648, %v615_v17 }
 0x16f   : > { %v704_v6 = vsel %vm703_vm11, %v1991_v48, %v700_v15  ;;  %1996 = vrcp.f32 %v2526_v20  ;;  %v643_v48 = vmul.f32 %v642_v4, %v2495_v10  ;;  %vm621_vm11 = vweird.f32 %v615_v17 }
 0x170   : > { %v709_v7 = vsel %vm706_vm12, %v708_v19, %v704_v6  ;;  %v744_v45 = vsel %vm743_vm15, %v1993_v0, %v740_v33  ;;  %v665_v63 = vand.u32 2147483647, %v2526_v20  ;;  %v667_v26 = vand.u32 2147483648, %v2526_v20 }
 0x171   : > { %v710_v31 = vmul.f32 %v709_v7, %v685_v18  ;;  %v749_v50 = vsel %vm746_vm9, %v748_v37, %v744_v45  ;;  %v644_v10 = vadd.f32 1.1283791, %v643_v48  ;;  %v605_v5 = vmul.f32 %v604_v56, %v2482_v59  ;;  %v767_v7 = vpop.permute.xlu1 %766 }
 0x172   : > { %v750_v29 = vmul.f32 %v749_v50, %v725_v36  ;;  %vm626_vm14 = vcmp.eq.f32.partialorder %v625_v57, 8.507059e+37  ;;  %v628_v9 = vor.u32 1.1754944e-38, %v627_v32  ;;  %vm661_vm15 = vweird.f32 %v2526_v20 }
 0x173   : > { %v1659_v3 = vclamps-f32 %v710_v31, 1.0  ;;  %v645_v16 = vmul.f32 %v644_v10, %v2485_v60  ;;  %vm666_vm8 = vcmp.eq.f32.partialorder %v665_v63, 8.507059e+37  ;;  %v769_v60 = vpop.permute.xlu2 %768 }
 0x174   : > { %v1995_v34 = vpop.eup %1994  ;;  %v1660_v28 = vclamps-f32 %v750_v29, 1.0  ;;  %v774_v23 = vsel %vm422_vm4, %v767_v7, %v769_v60 }
 0x175   : > { %v755_v43 = vadd.f32 1.0, %v1659_v3  ;;  %v617_v44 = vmul.f32 %v1995_v34, %v615_v17  ;;  %v1997_v46 = vpop.eup %1996  ;;  %vm622_vm10 = vweird.f32 %v1995_v34  ;;  %v668_v17 = vor.u32 1.1754944e-38, %v667_v26 }
 0x176   : > { %v657_v8 = vmul.f32 %v1997_v46, %v2526_v20  ;;  %vm662_vm12 = vweird.f32 %v1997_v46  ;;  %v756_v2 = vadd.f32 1.0, %v1660_v28  ;;  %vm623_vm13 = vmor %vm621_vm11, %vm622_vm10 }
 0x177   : > { %v618_v51 = vsub.f32 1.0, %v617_v44  ;;  %v759_v58 = vmul.f32 %v755_v43, %v587_v47  ;;  %vm663_vm9 = vmor %vm661_vm15, %vm662_vm12 }
 0x178   : > { %v658_v62 = vsub.f32 1.0, %v657_v8  ;;  %v760_v13 = vmul.f32 %v756_v2, %v588_v38 }
 0x179   : > { %v619_v61 = vmul.f32 %v1995_v34, %v618_v51  ;;  %v2545_v14 = vmul.f32 %v776_v55, %v759_v58 }
 0x17a   : > { %v659_v1 = vmul.f32 %v1997_v46, %v658_v62  ;;  %v2548_v59 = vmul.f32 %v773_v42, %v760_v13 }
 0x17b   : > { %v620_v0 = vadd.f32 %v1995_v34, %v619_v61 }
 0x17c   : > { %v660_v12 = vadd.f32 %v1997_v46, %v659_v1  ;;  %v1849_v20 = vpack.i.bf16 %v2548_v59, %v2545_v14 }
 0x17d   : > { %v624_v11 = vsel %vm623_vm13, %v1995_v34, %v620_v0  ;;  %v775_v34 = vsel %vm422_vm4, %v769_v60, %v771_v49 }
 0x17e   : > { %v629_v15 = vsel %vm626_vm14, %v628_v9, %v624_v11  ;;  %v664_v19 = vsel %vm663_vm9, %v1997_v46, %v660_v12  ;;  %1850 = vrot.lane.b32.xlu2 %v1849_v20, %s2145_s6 }
 0x17f   : > { %v630_v18 = vmul.f32 %v629_v15, %v605_v5  ;;  %v669_v21 = vsel %vm666_vm8, %v668_v17, %v664_v19  ;;  %vm2934_vm8 = vcmask 588800  }
 0x180   : > { %v670_v22 = vmul.f32 %v669_v21, %v645_v16  ;;  %vm2935_vm10 = vmmov %vm2934_vm8 }
 0x181   : > { %v1657_v6 = vclamps-f32 %v630_v18, 1.0  ;;  %vm2936_vm11 = vmmov %vm2934_vm8 }
 0x182   : > { %v1658_v25 = vclamps-f32 %v670_v22, 1.0  ;;  %vm2937_vm12 = vmmov %vm2934_vm8 }
 0x183   : > { %v753_v31 = vadd.f32 1.0, %v1657_v6 }
 0x184   : > { %v754_v3 = vadd.f32 1.0, %v1658_v25 }
 0x185   : > { %v757_v27 = vmul.f32 %v753_v31, %v585_v24 }
 0x186   : > { %v758_v4 = vmul.f32 %v754_v3, %v586_v30  ;;  %1870 = vrot.lane.b32.xlu2 %v1849_v20, %s2150_s18  ;;  %v909_v3 = vld [vmem:[%s2920_s4] sm:$0xff] }
 0x187   : > { %v2556_v33 = vmul.f32 %v774_v23, %v757_v27 }
 0x188   : > { %v2559_v35 = vmul.f32 %v775_v34, %v758_v4 }
 0x18a   : > { %v1834_v52 = vpack.i.bf16 %v2559_v35, %v2556_v33 }
 0x18c   : > { %1835 = vrot.lane.b32.xlu0 %v1834_v52, %s2149_s15  ;;  %1830 = vrot.lane.b32.xlu1 %v1834_v52, %s2146_s16 }
 0x18e   : > { %1880 = vrot.lane.b32.xlu2 %v1849_v20, %s2151_s20 }
 0x194   : > { %1840 = vrot.lane.b32.xlu0 %v1849_v20, %s2146_s16  ;;  %1845 = vrot.lane.b32.xlu1 %v1849_v20, %s2149_s15 }
 0x196   : > { %1885 = vrot.lane.b32.xlu2 %v1834_v52, %s2148_s22 }
 0x19c   : > { %1855 = vrot.lane.b32.xlu0 %v1849_v20, %s2148_s22  ;;  %1860 = vrot.lane.b32.xlu1 %v1849_v20, %s2147_s11 }
 0x19e   : > { %1900 = vrot.lane.b32.xlu2 %v1834_v52, %s2152_s21 }
 0x1a4   : > { %1875 = vrot.lane.b32.xlu0 %v1849_v20, %s2152_s21  ;;  %1865 = vrot.lane.b32.xlu1 %v1834_v52, %s2145_s6 }
 0x1a6   : > { %1179 = vrot.lane.b32.xlu2 %v2384_v41, %s2146_s16 }
 0x1ac   : > { %1890 = vrot.lane.b32.xlu0 %v1834_v52, %s2147_s11  ;;  %1895 = vrot.lane.b32.xlu1 %v1834_v52, %s2150_s18 }
 0x1ae   : > { %1177 = vrot.lane.b32.xlu2 %v2408_v54, %s2146_s16 }
 0x1b4   : > { %1905 = vrot.lane.b32.xlu0 %v1834_v52, %s2151_s20  ;;  %913 = vperm.xlu1 %1828, %v910_v53  }
 0x1bc   : > { %1181 = vrot.lane.b32.xlu0 %v2380_v39, %s2146_s16  ;;  %1175 = vrot.lane.b32.xlu1 %v2382_v40, %s2146_s16 }
 0x1d8   : > { %v2589_v36 = vpop.permute.xlu2 %1850 }
 0x1d9   : > { %v1852_v56 = vunpack.i.l.bf16 %v2589_v36  ;;  %v1853_v61 = vunpack.i.h.bf16 %v2589_v36 }
 0x1db   : > { %v874_v10 = vsel %vm454_vm2, %v1852_v56, %v1853_v61 }
 0x1e0   : > { %v2591_v43 = vpop.permute.xlu2 %1870 }
 0x1e1   : > { %v1872_v9 = vunpack.i.l.bf16 %v2591_v43  ;;  %v1873_v12 = vunpack.i.h.bf16 %v2591_v43 }
 0x1e3   : > { %v829_v16 = vsel %vm406_vm5, %v1872_v9, %v1873_v12 }
 0x1e8   : > { %v2596_v57 = vpop.permute.xlu2 %1880 }
 0x1e9   : > { %v1882_v24 = vunpack.i.l.bf16 %v2596_v57  ;;  %v1883_v31 = vunpack.i.h.bf16 %v2596_v57 }
 0x1eb   : > { %v799_v4 = vsel %vm374_vm7, %v1882_v24, %v1883_v31 }
 0x1f0   : > { %v1886_v13 = vpop.permute.xlu2 %1885 }
 0x1f1   : > { %v1888_v17 = vunpack.i.h.bf16 %v1886_v13  ;;  %v1887_v18 = vunpack.i.l.bf16 %v1886_v13 }
 0x1f3   : > { %v857_v27 = vsel %vm438_vm3, %v1887_v18, %v1888_v17 }
 0x1f8   : > { %v1901_v34 = vpop.permute.xlu2 %1900 }
 0x1fe   : > { %v1836_v37 = vpop.permute.xlu0 %1835  ;;  %v1831_v42 = vpop.permute.xlu1 %1830 }
 0x1ff   : > { %v1838_v44 = vunpack.i.h.bf16 %v1836_v37  ;;  %v1837_v45 = vunpack.i.l.bf16 %v1836_v37  ;;  %v1833_v46 = vunpack.i.h.bf16 %v1831_v42  ;;  %v1832_v47 = vunpack.i.l.bf16 %v1831_v42 }
 0x201   : > { %v902_v48 = vsel %vm486_vm0, %v1832_v47, %v1833_v46  ;;  %v887_v49 = vsel %vm470_vm1, %v1837_v45, %v1838_v44  ;;  %v1902_v45 = vunpack.i.l.bf16 %v1901_v34 }
 0x202   : > { %926 = vmatpush.msrb.mxu0 %v902_v48 }
 0x204   : > { %927 = vmatpush.msrb.mxu0 %v887_v49 }
 0x206   : > { %v1841_v38 = vpop.permute.xlu0 %1840  ;;  %v1846_v50 = vpop.permute.xlu1 %1845 }
 0x207   : > { %v1842_v51 = vunpack.i.l.bf16 %v1841_v38  ;;  %v1847_v8 = vunpack.i.l.bf16 %v1846_v50  ;;  %v1843_v29 = vunpack.i.h.bf16 %v1841_v38  ;;  %v1848_v55 = vunpack.i.h.bf16 %v1846_v50 }
 0x209   : > { %986 = vmatpush.msrb.mxu3 %v1843_v29  ;;  %v903_v32 = vsel %vm486_vm0, %v1833_v46, %v1842_v51  ;;  %v904_v58 = vsel %vm486_vm0, %v1842_v51, %v1843_v29  ;;  %v888_v62 = vsel %vm470_vm1, %v1838_v44, %v1847_v8  ;;  %v889_v28 = vsel %vm470_vm1, %v1847_v8, %v1848_v55 }
 0x20a   : > { %946 = vmatpush.msrb.mxu1 %v903_v32  ;;  %966 = vmatpush.msrb.mxu2 %v904_v58  ;;  %v1903_v44 = vunpack.i.h.bf16 %v1901_v34 }
 0x20b   : > { %987 = vmatpush.msrb.mxu3 %v1848_v55 }
 0x20c   : > { %947 = vmatpush.msrb.mxu1 %v888_v62  ;;  %967 = vmatpush.msrb.mxu2 %v889_v28  ;;  %v812_v49 = vsel %vm390_vm6, %v1902_v45, %v1903_v44 }
 0x20d   : > { %988 = vmatpush.msrb.mxu3 %v1853_v61 }
 0x20e   : > { %v1856_v63 = vpop.permute.xlu0 %1855  ;;  %v1861_v26 = vpop.permute.xlu1 %1860  ;;  %968 = vmatpush.msrb.mxu2 %v874_v10 }
 0x20f   : > { %v1857_v0 = vunpack.i.l.bf16 %v1856_v63  ;;  %v1862_v1 = vunpack.i.l.bf16 %v1861_v26  ;;  %v1858_v2 = vunpack.i.h.bf16 %v1856_v63  ;;  %v1863_v5 = vunpack.i.h.bf16 %v1861_v26 }
 0x211   : > { %989 = vmatpush.msrb.mxu3 %v1858_v2  ;;  %v859_v11 = vsel %vm438_vm3, %v1857_v0, %v1858_v2  ;;  %v844_v15 = vsel %vm422_vm4, %v1862_v1, %v1863_v5  ;;  %v858_v30 = vsel %vm438_vm3, %v1888_v17, %v1857_v0 }
 0x212   : > { %969 = vmatpush.msrb.mxu2 %v859_v11 }
 0x213   : > { %990 = vmatpush.msrb.mxu3 %v1863_v5 }
 0x214   : > { %970 = vmatpush.msrb.mxu2 %v844_v15 }
 0x215   : > { %991 = vmatpush.msrb.mxu3 %v1873_v12 }
 0x216   : > { %v1876_v19 = vpop.permute.xlu0 %1875  ;;  %v1866_v21 = vpop.permute.xlu1 %1865  ;;  %971 = vmatpush.msrb.mxu2 %v829_v16 }
 0x217   : > { %v1877_v6 = vunpack.i.l.bf16 %v1876_v19  ;;  %v1868_v22 = vunpack.i.h.bf16 %v1866_v21  ;;  %v1867_v20 = vunpack.i.l.bf16 %v1866_v21  ;;  %v1878_v7 = vunpack.i.h.bf16 %v1876_v19 }
 0x219   : > { %992 = vmatpush.msrb.mxu3 %v1878_v7  ;;  %v872_v25 = vsel %vm454_vm2, %v1867_v20, %v1868_v22  ;;  %v873_v60 = vsel %vm454_vm2, %v1868_v22, %v1852_v56  ;;  %v814_v23 = vsel %vm390_vm6, %v1877_v6, %v1878_v7 }
 0x21a   : > { %928 = vmatpush.msrb.mxu0 %v872_v25  ;;  %948 = vmatpush.msrb.mxu1 %v873_v60 }
 0x21b   : > { %972 = vmatpush.msrb.mxu2 %v814_v23  ;;  %993 = vmatpush.msrb.mxu3 %v1883_v31 }
 0x21c   : > { %929 = vmatpush.msrb.mxu0 %v857_v27  ;;  %949 = vmatpush.msrb.mxu1 %v858_v30 }
 0x21d   : > { %973 = vmatpush.msrb.mxu2 %v799_v4  ;;  %994 = vmatpush.msrb.mxu3 %v2548_v59 }
 0x21e   : > { %v1891_v52 = vpop.permute.xlu0 %1890  ;;  %v1896_v53 = vpop.permute.xlu1 %1895  ;;  %1664 = vmatmul.msk.f32.vlgmr.msrb.gmra.mxu3 %vm2934_vm8, %v909_v3 }
 0x21f   : > { %v1893_v36 = vunpack.i.h.bf16 %v1891_v52  ;;  %v1892_v37 = vunpack.i.l.bf16 %v1891_v52  ;;  %v1898_v42 = vunpack.i.h.bf16 %v1896_v53  ;;  %v1897_v43 = vunpack.i.l.bf16 %v1896_v53  ;;  %974 = vmatpush.msrb.mxu2 %v2545_v14 }
 0x220   : > { %1663 = vmatmul.msk.f32.vlgmr.msrb.gmra.mxu2 %vm2935_vm10, %v909_v3  ;;  %v813_v14 = vsel %vm390_vm6, %v1903_v44, %v1877_v6 }
 0x221   : > { %v842_v46 = vsel %vm422_vm4, %v1892_v37, %v1893_v36  ;;  %v843_v47 = vsel %vm422_vm4, %v1893_v36, %v1862_v1  ;;  %v827_v59 = vsel %vm406_vm5, %v1897_v43, %v1898_v42  ;;  %v828_v48 = vsel %vm406_vm5, %v1898_v42, %v1872_v9 }
 0x222   : > { %930 = vmatpush.msrb.mxu0 %v842_v46  ;;  %950 = vmatpush.msrb.mxu1 %v843_v47 }
 0x224   : > { %931 = vmatpush.msrb.mxu0 %v827_v59  ;;  %951 = vmatpush.msrb.mxu1 %v828_v48 }
 0x226   : > { %v1906_v38 = vpop.permute.xlu0 %1905  ;;  %932 = vmatpush.msrb.mxu0 %v812_v49  ;;  %952 = vmatpush.msrb.mxu1 %v813_v14  ;;  %v914_v55 = vpop.permute.xlu1 %913 }
 0x227   : > { %v1908_v50 = vunpack.i.h.bf16 %v1906_v38  ;;  %v1907_v51 = vunpack.i.l.bf16 %v1906_v38 }
 0x229   : > { %v797_v8 = vsel %vm374_vm7, %v1907_v51, %v1908_v50  ;;  %v798_v29 = vsel %vm374_vm7, %v1908_v50, %v1882_v24 }
 0x22a   : > { %933 = vmatpush.msrb.mxu0 %v797_v8  ;;  %953 = vmatpush.msrb.mxu1 %v798_v29 }
 0x22c   : > { %934 = vmatpush.msrb.mxu0 %v2556_v33  ;;  %954 = vmatpush.msrb.mxu1 %v2559_v35 }
 0x22d   : > { %1661 = vmatmul.msk.f32.vlgmr.msrb.gmra.mxu0 %vm2936_vm11, %v909_v3  ;;  %1662 = vmatmul.msk.f32.vlgmr.msrb.gmra.mxu1 %vm2937_vm12, %v909_v3 }
 0x2a1   : > { %v996_v56 = vpop.f32.mrf.mxu3 }
 0x2a2   : > { %v2636_v57 = vadd.f32 %v996_v56, %v914_v55 }
 0x2a3   : > { %v976_v32 = vpop.f32.mrf.mxu2 }
 0x2a4   : > { %v2639_v58 = vmul.f32 0.70710677, %v2636_v57  ;;  %v2641_v61 = vadd.f32 %v976_v32, %v914_v55 }
 0x2a6   : > { %v1127_v62 = vmul.f32 %v2639_v58, %v2639_v58  ;;  %v2646_v33 = vmul.f32 0.70710677, %v2641_v61 }
 0x2a8   : > { %v2648_v35 = vmin.f32 %v1127_v62, 16.0  ;;  %v1087_v28 = vmul.f32 %v2646_v33, %v2646_v33 }
 0x2aa   : > { %v1129_v10 = vmul.f32 2.1237322e-06, %v2648_v35  ;;  %v1140_v63 = vmul.f32 3.8918573e-05, %v2648_v35  ;;  %v2654_v26 = vmin.f32 %v1087_v28, 16.0  ;;  %v936_v0 = vpop.f32.mrf.mxu0  ;;  %v956_v1 = vpop.f32.mrf.mxu1 }
 0x2ab   : > { %v2656_v2 = vadd.f32 %v936_v0, %v914_v55  ;;  %v2658_v5 = vadd.f32 %v956_v1, %v914_v55 }
 0x2ac   : > { %v1130_v9 = vadd.f32 0.00028619796, %v1129_v10  ;;  %v1141_v11 = vadd.f32 0.001143296, %v1140_v63  ;;  %v1089_v12 = vmul.f32 2.1237322e-06, %v2654_v26 }
 0x2ad   : > { %v1100_v13 = vmul.f32 3.8918573e-05, %v2654_v26  ;;  %v2663_v15 = vmul.f32 0.70710677, %v2656_v2  ;;  %v2668_v18 = vmul.f32 0.70710677, %v2658_v5 }
 0x2ae   : > { %v1131_v16 = vmul.f32 %v1130_v9, %v2648_v35  ;;  %v1142_v17 = vmul.f32 %v1141_v11, %v2648_v35  ;;  %v1090_v22 = vadd.f32 0.00028619796, %v1089_v12 }
 0x2af   : > { %v1101_v19 = vadd.f32 0.001143296, %v1100_v13  ;;  %v1007_v21 = vmul.f32 %v2663_v15, %v2663_v15  ;;  %v1047_v20 = vmul.f32 %v2668_v18, %v2668_v18 }
 0x2b0   : > { %v1143_v6 = vadd.f32 0.014752088, %v1142_v17  ;;  %v1132_v31 = vadd.f32 0.0036580483, %v1131_v16  ;;  %v1091_v4 = vmul.f32 %v1090_v22, %v2654_v26 }
 0x2b1   : > { %v1102_v7 = vmul.f32 %v1101_v19, %v2654_v26  ;;  %v2675_v24 = vmin.f32 %v1007_v21, 16.0  ;;  %v2678_v60 = vmin.f32 %v1047_v20, 16.0 }
 0x2b2   : > { %v1144_v25 = vmul.f32 %v1143_v6, %v2648_v35  ;;  %v1133_v42 = vmul.f32 %v1132_v31, %v2648_v35  ;;  %v1092_v49 = vadd.f32 0.0036580483, %v1091_v4 }
 0x2b3   : > { %v1103_v23 = vadd.f32 0.014752088, %v1102_v7  ;;  %v1009_v27 = vmul.f32 2.1237322e-06, %v2675_v24  ;;  %v1020_v30 = vmul.f32 3.8918573e-05, %v2675_v24 }
 0x2b4   : > { %v1145_v3 = vadd.f32 0.112945676, %v1144_v25  ;;  %v1049_v34 = vmul.f32 2.1237322e-06, %v2678_v60  ;;  %v1060_v37 = vmul.f32 3.8918573e-05, %v2678_v60  ;;  %v1093_v10 = vmul.f32 %v1092_v49, %v2654_v26 }
 0x2b5   : > { %v1104_v52 = vmul.f32 %v1103_v23, %v2654_v26  ;;  %v1010_v53 = vadd.f32 0.00028619796, %v1009_v27  ;;  %v1021_v36 = vadd.f32 0.001143296, %v1020_v30  ;;  %v1134_v8 = vadd.f32 0.05243302, %v1133_v42 }
 0x2b6   : > { %v1146_v43 = vmul.f32 %v1145_v3, %v2648_v35  ;;  %v1050_v44 = vadd.f32 0.00028619796, %v1049_v34  ;;  %v1061_v59 = vadd.f32 0.001143296, %v1060_v37  ;;  %v1094_v16 = vadd.f32 0.05243302, %v1093_v10 }
 0x2b7   : > { %v1105_v45 = vadd.f32 0.112945676, %v1104_v52  ;;  %v1011_v46 = vmul.f32 %v1010_v53, %v2675_v24  ;;  %v1022_v47 = vmul.f32 %v1021_v36, %v2675_v24  ;;  %v1135_v11 = vmul.f32 %v1134_v8, %v2648_v35 }
 0x2b8   : > { %v1147_v48 = vadd.f32 0.4994258, %v1146_v43  ;;  %v1051_v50 = vmul.f32 %v1050_v44, %v2678_v60  ;;  %v1062_v51 = vmul.f32 %v1061_v59, %v2678_v60  ;;  %v1095_v25 = vmul.f32 %v1094_v16, %v2654_v26 }
 0x2b9   : > { %v1106_v14 = vmul.f32 %v1105_v45, %v2654_v26  ;;  %v1023_v38 = vadd.f32 0.014752088, %v1022_v47  ;;  %v1012_v56 = vadd.f32 0.0036580483, %v1011_v46  ;;  %v1136_v6 = vadd.f32 0.18741608, %v1135_v11 }
 0x2ba   : > { %v1148_v29 = vmul.f32 %v1147_v48, %v2648_v35  ;;  %v1063_v62 = vadd.f32 0.014752088, %v1062_v51  ;;  %v1052_v1 = vadd.f32 0.0036580483, %v1051_v50  ;;  %v1096_v42 = vadd.f32 0.18741608, %v1095_v25 }
 0x2bb   : > { %v1107_v55 = vadd.f32 0.4994258, %v1106_v14  ;;  %v1024_v32 = vmul.f32 %v1023_v38, %v2675_v24  ;;  %v1013_v13 = vmul.f32 %v1012_v56, %v2675_v24  ;;  %v1137_v34 = vmul.f32 %v1136_v6, %v2648_v35 }
 0x2bc   : > { %v2695_v28 = vadd.f32 1.0, %v1148_v29  ;;  %v1064_v9 = vmul.f32 %v1063_v62, %v2678_v60  ;;  %v1053_v21 = vmul.f32 %v1052_v1, %v2678_v60  ;;  %v1097_v48 = vmul.f32 %v1096_v42, %v2654_v26 }
 0x2bd   : > { %v1108_v63 = vmul.f32 %v1107_v55, %v2654_v26  ;;  %v1025_v0 = vadd.f32 0.112945676, %v1024_v32  ;;  %v1014_v22 = vadd.f32 0.05243302, %v1013_v13  ;;  %v1138_v47 = vadd.f32 1.1283791, %v1137_v34 }
 0x2be   : > { %1998 = vrcp.f32 %v2695_v28  ;;  %v1065_v19 = vadd.f32 0.112945676, %v1064_v9  ;;  %v1054_v30 = vadd.f32 0.05243302, %v1053_v21  ;;  %v1159_v38 = vand.u32 2147483647, %v2695_v28 }
 0x2bf   : > { %v2702_v12 = vadd.f32 1.0, %v1108_v63  ;;  %v1026_v17 = vmul.f32 %v1025_v0, %v2675_v24  ;;  %v1015_v52 = vmul.f32 %v1014_v22, %v2675_v24  ;;  %v1161_v50 = vand.u32 2147483648, %v2695_v28  ;;  %v1182_v0 = vpop.permute.xlu0 %1181  ;;  %v1311_v13 = vld [vmem:[%s2923_s7] sm:$0xff] }
 0x2c0   : > { %v1066_v7 = vmul.f32 %v1065_v19, %v2678_v60  ;;  %v1055_v44 = vmul.f32 %v1054_v30, %v2678_v60  ;;  %v1139_v8 = vmul.f32 %v1138_v47, %v2639_v58  ;;  %vm1155_vm13 = vweird.f32 %v2695_v28 }
 0x2c1   : > { %2000 = vrcp.f32 %v2702_v12  ;;  %v1027_v20 = vadd.f32 0.4994258, %v1026_v17  ;;  %v1016_v35 = vadd.f32 0.18741608, %v1015_v52  ;;  %v1119_v29 = vand.u32 2147483647, %v2702_v12 }
 0x2c2   : > { %v1067_v3 = vadd.f32 0.4994258, %v1066_v7  ;;  %v1056_v14 = vadd.f32 0.18741608, %v1055_v44  ;;  %v1098_v56 = vadd.f32 1.1283791, %v1097_v48  ;;  %vm1115_vm10 = vweird.f32 %v2702_v12  ;;  %v1180_v7 = vpop.permute.xlu2 %1179 }
 0x2c3   : > { %v1028_v27 = vmul.f32 %v1027_v20, %v2675_v24  ;;  %v1017_v55 = vmul.f32 %v1016_v35, %v2675_v24  ;;  %v1121_v10 = vand.u32 2147483648, %v2702_v12  ;;  %vm2745_vm9 = vcmp.eq.f32.partialorder %v1159_v38, 8.507059e+37 }
 0x2c4   : > { %v2709_v31 = vpop.eup %1998  ;;  %v1068_v36 = vmul.f32 %v1067_v3, %v2678_v60  ;;  %v1057_v58 = vmul.f32 %v1056_v14, %v2678_v60  ;;  %v1162_v24 = vor.u32 1.1754944e-38, %v1161_v50  ;;  %vm2757_vm11 = vcmp.eq.f32.partialorder %v1119_v29, 8.507059e+37 }
 0x2c5   : > { %v1151_v23 = vmul.f32 %v2709_v31, %v2695_v28  ;;  %v2719_v53 = vadd.f32 1.0, %v1028_v27  ;;  %vm1156_vm14 = vweird.f32 %v2709_v31  ;;  %v1018_v60 = vadd.f32 1.1283791, %v1017_v55 }
 0x2c6   : > { %v2726_v46 = vadd.f32 1.0, %v1068_v36  ;;  %vm2752_vm8 = vmor %vm1155_vm13, %vm1156_vm14  ;;  %v1122_v6 = vor.u32 1.1754944e-38, %v1121_v10  ;;  %v1058_v22 = vadd.f32 1.1283791, %v1057_v58  ;;  %v999_v14 = vmul.f32 0.5, %v2656_v2 }
 0x2c7   : > { %v2715_v4 = vpop.eup %2000  ;;  %v1152_v37 = vsub.f32 1.0, %v1151_v23  ;;  %2002 = vrcp.f32 %v2719_v53  ;;  %v1041_v9 = vand.u32 2147483648, %v2719_v53  ;;  %v1039_v21 = vand.u32 2147483647, %v2719_v53 }
 0x2c8   : > { %v1111_v43 = vmul.f32 %v2715_v4, %v2702_v12  ;;  %2004 = vrcp.f32 %v2726_v46  ;;  %vm1116_vm15 = vweird.f32 %v2715_v4  ;;  %vm1035_vm14 = vweird.f32 %v2719_v53 }
 0x2c9   : > { %v1153_v59 = vmul.f32 %v2709_v31, %v1152_v37  ;;  %vm2765_vm12 = vmor %vm1115_vm10, %vm1116_vm15  ;;  %v1081_v23 = vand.u32 2147483648, %v2726_v46  ;;  %v1079_v3 = vand.u32 2147483647, %v2726_v46  ;;  %v1019_v34 = vmul.f32 %v1018_v60, %v2663_v15 }
 0x2ca   : > { %v1112_v45 = vsub.f32 1.0, %v1111_v43  ;;  %vm1040_vm10 = vcmp.eq.f32.partialorder %v1039_v21, 8.507059e+37  ;;  %v1059_v47 = vmul.f32 %v1058_v22, %v2668_v18  ;;  %v1000_v55 = vmul.f32 0.5, %v2658_v5 }
 0x2cb   : > { %v1154_v26 = vadd.f32 %v2709_v31, %v1153_v59  ;;  %v1082_v44 = vor.u32 1.1754944e-38, %v1081_v23  ;;  %v1002_v10 = vmul.f32 0.5, %v2636_v57  ;;  %v1001_v58 = vmul.f32 0.5, %v2641_v61 }
 0x2cc   : > { %v1113_v49 = vmul.f32 %v2715_v4, %v1112_v45 }
 0x2cd   : > { %v2003_v51 = vpop.eup %2002  ;;  %v1158_v17 = vsel %vm2752_vm8, %v2709_v31, %v1154_v26  ;;  %v1042_v31 = vor.u32 1.1754944e-38, %v1041_v9  ;;  %v1185_v9 = vsel %vm486_vm0, %v1180_v7, %v1182_v0 }
 0x2ce   : > { %v1031_v32 = vmul.f32 %v2003_v51, %v2719_v53  ;;  %v1114_v62 = vadd.f32 %v2715_v4, %v1113_v49  ;;  %v2005_v63 = vpop.eup %2004  ;;  %vm1036_vm13 = vweird.f32 %v2003_v51  ;;  %v1163_v27 = vsel %vm2745_vm9, %v1162_v24, %v1158_v17  ;;  %v1176_v49 = vpop.permute.xlu1 %1175 }
 0x2cf   : > { %v1071_v16 = vmul.f32 %v2005_v63, %v2726_v46  ;;  %vm1037_vm15 = vmor %vm1035_vm14, %vm1036_vm13  ;;  %vm1076_vm8 = vweird.f32 %v2005_v63  ;;  %v1099_v53 = vmul.f32 %v1098_v56, %v2646_v33  ;;  %v1164_v42 = vmul.f32 %v1163_v27, %v1139_v8 }
 0x2d0   : > { %v1032_v1 = vsub.f32 1.0, %v1031_v32  ;;  %v1118_v12 = vsel %vm2765_vm12, %v2715_v4, %v1114_v62  ;;  %vm1075_vm12 = vweird.f32 %v2726_v46  ;;  %vm1080_vm13 = vcmp.eq.f32.partialorder %v1079_v3, 8.507059e+37  ;;  %v1178_v46 = vpop.permute.xlu2 %1177 }
 0x2d1   : > { %v1072_v20 = vsub.f32 1.0, %v1071_v16  ;;  %v1123_v4 = vsel %vm2757_vm11, %v1122_v6, %v1118_v12  ;;  %vm1077_vm9 = vmor %vm1075_vm12, %vm1076_vm8  ;;  %v1668_v38 = vclamps-f32 %v1164_v42, 1.0  ;;  %v1183_v29 = vsel %vm486_vm0, %v1176_v49, %v1178_v46 }
 0x2d2   : > { %v1033_v28 = vmul.f32 %v2003_v51, %v1032_v1  ;;  %v1124_v45 = vmul.f32 %v1123_v4, %v1099_v53  ;;  %v1184_v2 = vsel %vm486_vm0, %v1178_v46, %v1180_v7 }
 0x2d3   : > { %v1073_v30 = vmul.f32 %v2005_v63, %v1072_v20  ;;  %v1170_v18 = vadd.f32 1.0, %v1668_v38 }
 0x2d4   : > { %v1034_v25 = vadd.f32 %v2003_v51, %v1033_v28  ;;  %v1667_v50 = vclamps-f32 %v1124_v45, 1.0 }
 0x2d5   : > { %v1074_v37 = vadd.f32 %v2005_v63, %v1073_v30  ;;  %v1174_v24 = vmul.f32 %v1170_v18, %v1002_v10 }
 0x2d6   : > { %v1038_v52 = vsel %vm1037_vm15, %v2003_v51, %v1034_v25  ;;  %v1169_v56 = vadd.f32 1.0, %v1667_v50 }
 0x2d7   : > { %v1043_v36 = vsel %vm1040_vm10, %v1042_v31, %v1038_v52  ;;  %v1078_v35 = vsel %vm1077_vm9, %v2005_v63, %v1074_v37  ;;  %v1193_v11 = vmul.f32 %v1182_v0, %v1174_v24 }
 0x2d8   : > { %v1044_v43 = vmul.f32 %v1043_v36, %v1019_v34  ;;  %v1083_v48 = vsel %vm1080_vm13, %v1082_v44, %v1078_v35  ;;  %v1173_v1 = vmul.f32 %v1169_v56, %v1001_v58  ;;  %vm1520_vm13 = vcmask 580608  }
 0x2d9   : > { %v1084_v15 = vmul.f32 %v1083_v48, %v1059_v47 }
 0x2da   : > { %v1665_v59 = vclamps-f32 %v1044_v43, 1.0  ;;  %v2800_v57 = vmul.f32 %v1185_v9, %v1173_v1 }
 0x2db   : > { %v1666_v51 = vclamps-f32 %v1084_v15, 1.0 }
 0x2dc   : > { %v1167_v33 = vadd.f32 1.0, %v1665_v59  ;;  %v1944_v61 = vpack.i.bf16 %v1193_v11, %v2800_v57 }
 0x2dd   : > { %v1168_v26 = vadd.f32 1.0, %v1666_v51 }
 0x2de   : > { %v1171_v8 = vmul.f32 %v1167_v33, %v999_v14 }
 0x2df   : > { %v1172_v32 = vmul.f32 %v1168_v26, %v1000_v55 }
 0x2e0   : > { %v2787_v62 = vmul.f32 %v1183_v29, %v1171_v8 }
 0x2e1   : > { %v2792_v63 = vmul.f32 %v1184_v2, %v1172_v32 }
 0x2e3   : > { %v1919_v5 = vpack.i.bf16 %v2792_v63, %v2787_v62 }
 0x2e5   : > { %1920 = vrot.lane.b32.xlu2 %v1919_v5, %s2145_s6  ;;  %1915 = vrot.lane.b32.xlu0 %v1919_v5, %s2149_s15 }
 0x2e6   : > { %1910 = vrot.lane.b32.xlu1 %v1919_v5, %s2146_s16 }
 0x2ed   : > { %1945 = vrot.lane.b32.xlu2 %v1944_v61, %s2145_s6  ;;  %1930 = vrot.lane.b32.xlu0 %v1919_v5, %s2147_s11 }
 0x2ee   : > { %1925 = vrot.lane.b32.xlu1 %v1919_v5, %s2148_s22 }
 0x2f5   : > { %1955 = vrot.lane.b32.xlu2 %v1944_v61, %s2147_s11  ;;  %1935 = vrot.lane.b32.xlu0 %v1944_v61, %s2146_s16  ;;  %s2154_s16 = smov 71   ;;  %s1680_s11 = smul.u32 24, %s2293_s24 }
 0x2f6   : > { %1940 = vrot.lane.b32.xlu1 %v1944_v61, %s2149_s15 }
 0x2fd   : > { %1975 = vrot.lane.b32.xlu2 %v1944_v61, %s2151_s20  ;;  %1950 = vrot.lane.b32.xlu0 %v1944_v61, %s2148_s22  ;;  %s1679_s22 = smul.u32 24, %s2221_s9  ;;  %s351_s9 = scalar_lea.vmem [#allocation7], %s1680_s11 }
 0x2fe   : > { %1960 = vrot.lane.b32.xlu1 %v1944_v61, %s2150_s18 }
 0x305   : > { %1980 = vrot.lane.b32.xlu2 %v1919_v5, %s2152_s21  ;;  %1970 = vrot.lane.b32.xlu0 %v1944_v61, %s2152_s21  ;;  %s1547_s21 = sshll.u32 %s351_s9, 4  ;;  %s1548_s21 = int_to_ptr.vmem [resolvable:$true] %s1547_s21 }
 0x306   : > { %1965 = vrot.lane.b32.xlu1 %v1919_v5, %s2150_s18 }
 0x30d   : > { %1985 = vrot.lane.b32.xlu0 %v1919_v5, %s2151_s20  ;;  %1512 = vrot.lane.b32.xlu2 %v2382_v40, %s2154_s16  ;;  %s1545_s20 = scalar_lea.hbm %s2924_s8, %s1679_s22 }
 0x30e   : > { %1314 = vperm.xlu1 %1828, %v1311_v13   ;;  %s1549_s14 = sshll.u32 %s1545_s20, 4  ;;  %s1550_s14 = int_to_ptr.hbm [resolvable:$true] %s1549_s14 }
 0x30f   : > { %s2086_s25 = sshra.s32 %s1550_s14, 4  ;;  %s2087_s25 = int_to_ptr.hbm [resolvable:$true] %s2086_s25 }
 0x310   : > { %s2088_s10 = scalar_lea.hbm %s2087_s25, 24  ;;  %p2093_p10 = scmp.lt.s32.totalorder %s2087_s25, %s2924_s8 }
 0x311   : > { %p2089_p4 = scmp.ne.s32.totalorder %s2087_s25, %s2088_s10  ;;  %p2094_p2 = scmp.lt.s32.totalorder %s2092_s13, %s2088_s10 }
 0x313   : > { %p2090_p8 = pnand %p2089_p4, %p2266_p3  ;;  %p2095_p11 = por %p2094_p2, %p2093_p10 }
 0x315   : > { %1514 = vrot.lane.b32.xlu0 %v2408_v54, %s2154_s16  ;;  %1518 = vrot.lane.b32.xlu2 %v2380_v39, %s2154_s16  ;;  %p2091_p9 = pneg %p2090_p8 }
 0x316   : > { %1516 = vrot.lane.b32.xlu1 %v2384_v41, %s2154_s16 }
 0x317   : > { %p2096_p12 = pnand %p2095_p11, %p2091_p9 }
 0x33f   : > { %v1921_v60 = vpop.permute.xlu2 %1920 }
 0x340   : > { %v1923_v22 = vunpack.i.h.bf16 %v1921_v60  ;;  %v1922_v20 = vunpack.i.l.bf16 %v1921_v60 }
 0x342   : > { %v1276_v39 = vsel %vm454_vm2, %v1922_v20, %v1923_v22 }
 0x347   : > { %v1946_v17 = vpop.permute.xlu2 %1945 }
 0x348   : > { %v1948_v43 = vunpack.i.h.bf16 %v1946_v17  ;;  %v1947_v44 = vunpack.i.l.bf16 %v1946_v17 }
 0x34a   : > { %v1277_v15 = vsel %vm454_vm2, %v1923_v22, %v1947_v44  ;;  %v1278_v49 = vsel %vm454_vm2, %v1947_v44, %v1948_v43 }
 0x34f   : > { %v1956_v30 = vpop.permute.xlu2 %1955 }
 0x350   : > { %v1958_v33 = vunpack.i.h.bf16 %v1956_v30  ;;  %v1957_v38 = vunpack.i.l.bf16 %v1956_v30 }
 0x352   : > { %v1250_v56 = vsel %vm422_vm4, %v1957_v38, %v1958_v33 }
 0x357   : > { %v1916_v16 = vpop.permute.xlu0 %1915  ;;  %v1976_v35 = vpop.permute.xlu2 %1975 }
 0x358   : > { %v1911_v19 = vpop.permute.xlu1 %1910  ;;  %v1918_v28 = vunpack.i.h.bf16 %v1916_v16  ;;  %v1917_v21 = vunpack.i.l.bf16 %v1916_v16  ;;  %v1978_v58 = vunpack.i.h.bf16 %v1976_v35  ;;  %v1977_v0 = vunpack.i.l.bf16 %v1976_v35 }
 0x359   : > { %v1913_v12 = vunpack.i.h.bf16 %v1911_v19  ;;  %v1912_v6 = vunpack.i.l.bf16 %v1911_v19 }
 0x35a   : > { %v1290_v40 = vsel %vm470_vm1, %v1917_v21, %v1918_v28  ;;  %v1208_v19 = vsel %vm374_vm7, %v1977_v0, %v1978_v58 }
 0x35b   : > { %v1304_v7 = vsel %vm486_vm0, %v1912_v6, %v1913_v12 }
 0x35c   : > { %1327 = vmatpush.msra.mxu0 %v1304_v7 }
 0x35e   : > { %1328 = vmatpush.msra.mxu0 %v1290_v40 }
 0x35f   : > { %v1931_v54 = vpop.permute.xlu0 %1930  ;;  %v1981_v32 = vpop.permute.xlu2 %1980 }
 0x360   : > { %v1926_v41 = vpop.permute.xlu1 %1925  ;;  %1329 = vmatpush.msra.mxu0 %v1276_v39  ;;  %v1933_v25 = vunpack.i.h.bf16 %v1931_v54  ;;  %v1932_v31 = vunpack.i.l.bf16 %v1931_v54  ;;  %v1983_v9 = vunpack.i.h.bf16 %v1981_v32  ;;  %v1982_v11 = vunpack.i.l.bf16 %v1981_v32 }
 0x361   : > { %v1928_v23 = vunpack.i.h.bf16 %v1926_v41  ;;  %v1927_v27 = vunpack.i.l.bf16 %v1926_v41 }
 0x362   : > { %v1248_v4 = vsel %vm422_vm4, %v1932_v31, %v1933_v25  ;;  %v1249_v18 = vsel %vm422_vm4, %v1933_v25, %v1957_v38 }
 0x363   : > { %v1262_v3 = vsel %vm438_vm3, %v1927_v27, %v1928_v23 }
 0x364   : > { %1330 = vmatpush.msra.mxu0 %v1262_v3 }
 0x366   : > { %1331 = vmatpush.msra.mxu0 %v1248_v4 }
 0x367   : > { %v1936_v34 = vpop.permute.xlu0 %1935 }
 0x368   : > { %v1938_v52 = vunpack.i.h.bf16 %v1936_v34  ;;  %v1937_v53 = vunpack.i.l.bf16 %v1936_v34  ;;  %v1941_v36 = vpop.permute.xlu1 %1940 }
 0x369   : > { %v1943_v37 = vunpack.i.h.bf16 %v1941_v36  ;;  %v1942_v42 = vunpack.i.l.bf16 %v1941_v36 }
 0x36a   : > { %v1305_v45 = vsel %vm486_vm0, %v1913_v12, %v1937_v53  ;;  %v1306_v47 = vsel %vm486_vm0, %v1937_v53, %v1938_v52  ;;  %v1310_v12 = vld [vmem:[#allocation5] sm:$0xff]  ;;  %vm2946_vm0 = vcmask 588800  }
 0x36b   : > { %1347 = vmatpush.msra.mxu1 %v1305_v45  ;;  %1367 = vmatpush.msra.mxu2 %v1306_v47  ;;  %v1291_v59 = vsel %vm470_vm1, %v1918_v28, %v1942_v42  ;;  %v1292_v48 = vsel %vm470_vm1, %v1942_v42, %v1943_v37  ;;  %v1220_v28 = vsel %vm390_vm6, %v1982_v11, %v1983_v9  ;;  %vm2947_vm1 = vmmov %vm2946_vm0 }
 0x36c   : > { %vm2948_vm2 = vmmov %vm2946_vm0 }
 0x36d   : > { %1348 = vmatpush.msra.mxu1 %v1291_v59  ;;  %1368 = vmatpush.msra.mxu2 %v1292_v48 }
 0x36f   : > { %v1951_v14 = vpop.permute.xlu0 %1950  ;;  %1349 = vmatpush.msra.mxu1 %v1277_v15  ;;  %1369 = vmatpush.msra.mxu2 %v1278_v49 }
 0x370   : > { %v1953_v50 = vunpack.i.h.bf16 %v1951_v14  ;;  %v1952_v51 = vunpack.i.l.bf16 %v1951_v14  ;;  %v1961_v46 = vpop.permute.xlu1 %1960 }
 0x371   : > { %v1963_v8 = vunpack.i.h.bf16 %v1961_v46  ;;  %v1962_v29 = vunpack.i.l.bf16 %v1961_v46 }
 0x372   : > { %v1263_v55 = vsel %vm438_vm3, %v1928_v23, %v1952_v51  ;;  %v1264_v26 = vsel %vm438_vm3, %v1952_v51, %v1953_v50 }
 0x373   : > { %1350 = vmatpush.msra.mxu1 %v1263_v55  ;;  %1370 = vmatpush.msra.mxu2 %v1264_v26  ;;  %v1236_v10 = vsel %vm406_vm5, %v1962_v29, %v1963_v8 }
 0x375   : > { %1351 = vmatpush.msra.mxu1 %v1249_v18  ;;  %1371 = vmatpush.msra.mxu2 %v1250_v56 }
 0x377   : > { %v1971_v2 = vpop.permute.xlu0 %1970  ;;  %1372 = vmatpush.msra.mxu2 %v1236_v10 }
 0x378   : > { %v1973_v24 = vunpack.i.h.bf16 %v1971_v2  ;;  %v1972_v1 = vunpack.i.l.bf16 %v1971_v2  ;;  %v1966_v5 = vpop.permute.xlu1 %1965 }
 0x379   : > { %v1968_v61 = vunpack.i.h.bf16 %v1966_v5  ;;  %v1967_v13 = vunpack.i.l.bf16 %v1966_v5 }
 0x37a   : > { %v1222_v60 = vsel %vm390_vm6, %v1972_v1, %v1973_v24  ;;  %v1221_v21 = vsel %vm390_vm6, %v1983_v9, %v1972_v1 }
 0x37b   : > { %v1234_v16 = vsel %vm406_vm5, %v1967_v13, %v1968_v61  ;;  %v1235_v17 = vsel %vm406_vm5, %v1968_v61, %v1962_v29  ;;  %1373 = vmatpush.msra.mxu2 %v1222_v60 }
 0x37c   : > { %1332 = vmatpush.msra.mxu0 %v1234_v16  ;;  %1352 = vmatpush.msra.mxu1 %v1235_v17 }
 0x37d   : > { %1374 = vmatpush.msra.mxu2 %v1208_v19 }
 0x37e   : > { %1333 = vmatpush.msra.mxu0 %v1220_v28  ;;  %1353 = vmatpush.msra.mxu1 %v1221_v21 }
 0x37f   : > { %v1986_v6 = vpop.permute.xlu0 %1985  ;;  %1375 = vmatpush.msra.mxu2 %v2800_v57 }
 0x380   : > { %v1988_v22 = vunpack.i.h.bf16 %v1986_v6  ;;  %v1987_v20 = vunpack.i.l.bf16 %v1986_v6  ;;  %1671 = vmatmul.msk.f32.vlgmr.msra.gmra.mxu2 %vm2946_vm0, %v1310_v12  ;;  %v1315_v54 = vpop.permute.xlu1 %1314 }
 0x382   : > { %v1206_v7 = vsel %vm374_vm7, %v1987_v20, %v1988_v22  ;;  %v1207_v40 = vsel %vm374_vm7, %v1988_v22, %v1977_v0 }
 0x383   : > { %1334 = vmatpush.msra.mxu0 %v1206_v7  ;;  %1354 = vmatpush.msra.mxu1 %v1207_v40 }
 0x385   : > { %1335 = vmatpush.msra.mxu0 %v2787_v62  ;;  %1355 = vmatpush.msra.mxu1 %v2792_v63 }
 0x386   : > { %1669 = vmatmul.msk.f32.vlgmr.msra.gmra.mxu0 %vm2947_vm1, %v1310_v12  ;;  %1670 = vmatmul.msk.f32.vlgmr.msra.gmra.mxu1 %vm2948_vm2, %v1310_v12 }
 0x403   : > { %v1337_v57 = vpop.f32.mrf.mxu0  ;;  %v1357_v39 = vpop.f32.mrf.mxu1 }
 0x404   : > { %v2853_v41 = vadd.f32 %v1337_v57, %v1315_v54  ;;  %v2855_v25 = vadd.f32 %v1357_v39, %v1315_v54  ;;  %v1377_v31 = vpop.f32.mrf.mxu2 }
 0x405   : > { %v2857_v23 = vadd.f32 %v1377_v31, %v1315_v54 }
 0x406   : > { %v2860_v27 = vmul.f32 0.70710677, %v2853_v41  ;;  %v2863_v62 = vmul.f32 0.70710677, %v2855_v25 }
 0x407   : > { %v2866_v63 = vmul.f32 0.70710677, %v2857_v23 }
 0x408   : > { %v1386_v30 = vmul.f32 %v2860_v27, %v2860_v27  ;;  %v1426_v3 = vmul.f32 %v2863_v62, %v2863_v62 }
 0x409   : > { %v1466_v4 = vmul.f32 %v2866_v63, %v2866_v63 }
 0x40a   : > { %v1387_v34 = vmin.f32 %v1386_v30, 16.0  ;;  %v1427_v52 = vmin.f32 %v1426_v3, 16.0 }
 0x40b   : > { %v1467_v53 = vmin.f32 %v1466_v4, 16.0 }
 0x40c   : > { %v1388_v36 = vmul.f32 2.1237322e-06, %v1387_v34  ;;  %v1399_v37 = vmul.f32 3.8918573e-05, %v1387_v34  ;;  %v1428_v42 = vmul.f32 2.1237322e-06, %v1427_v52 }
 0x40d   : > { %v1439_v43 = vmul.f32 3.8918573e-05, %v1427_v52  ;;  %v1468_v44 = vmul.f32 2.1237322e-06, %v1467_v53  ;;  %v1479_v45 = vmul.f32 3.8918573e-05, %v1467_v53 }
 0x40e   : > { %v1389_v47 = vadd.f32 0.00028619796, %v1388_v36  ;;  %v1400_v35 = vadd.f32 0.001143296, %v1399_v37  ;;  %v1429_v59 = vadd.f32 0.00028619796, %v1428_v42 }
 0x40f   : > { %v1440_v48 = vadd.f32 0.001143296, %v1439_v43  ;;  %v1469_v15 = vadd.f32 0.00028619796, %v1468_v44  ;;  %v1480_v49 = vadd.f32 0.001143296, %v1479_v45 }
 0x410   : > { %v1390_v14 = vmul.f32 %v1389_v47, %v1387_v34  ;;  %v1401_v33 = vmul.f32 %v1400_v35, %v1387_v34  ;;  %v1430_v38 = vmul.f32 %v1429_v59, %v1427_v52 }
 0x411   : > { %v1441_v50 = vmul.f32 %v1440_v48, %v1427_v52  ;;  %v1470_v51 = vmul.f32 %v1469_v15, %v1467_v53  ;;  %v1481_v46 = vmul.f32 %v1480_v49, %v1467_v53 }
 0x412   : > { %v1391_v8 = vadd.f32 0.0036580483, %v1390_v14  ;;  %v1402_v29 = vadd.f32 0.014752088, %v1401_v33  ;;  %v1431_v55 = vadd.f32 0.0036580483, %v1430_v38 }
 0x413   : > { %v1442_v26 = vadd.f32 0.014752088, %v1441_v50  ;;  %v1471_v18 = vadd.f32 0.0036580483, %v1470_v51  ;;  %v1482_v56 = vadd.f32 0.014752088, %v1481_v46 }
 0x414   : > { %v1392_v32 = vmul.f32 %v1391_v8, %v1387_v34  ;;  %v1403_v10 = vmul.f32 %v1402_v29, %v1387_v34  ;;  %v1432_v2 = vmul.f32 %v1431_v55, %v1427_v52  ;;  %v1513_v29 = vpop.permute.xlu2 %1512 }
 0x415   : > { %v1443_v58 = vmul.f32 %v1442_v26, %v1427_v52  ;;  %v1472_v0 = vmul.f32 %v1471_v18, %v1467_v53  ;;  %v1483_v24 = vmul.f32 %v1482_v56, %v1467_v53 }
 0x416   : > { %v1393_v1 = vadd.f32 0.05243302, %v1392_v32  ;;  %v1404_v5 = vadd.f32 0.112945676, %v1403_v10  ;;  %v1433_v9 = vadd.f32 0.05243302, %v1432_v2 }
 0x417   : > { %v1444_v11 = vadd.f32 0.112945676, %v1443_v58  ;;  %v1484_v61 = vadd.f32 0.112945676, %v1483_v24  ;;  %v1473_v17 = vadd.f32 0.05243302, %v1472_v0 }
 0x418   : > { %v1405_v13 = vmul.f32 %v1404_v5, %v1387_v34  ;;  %v1394_v60 = vmul.f32 %v1393_v1, %v1387_v34  ;;  %v1434_v21 = vmul.f32 %v1433_v9, %v1427_v52 }
 0x419   : > { %v1445_v16 = vmul.f32 %v1444_v11, %v1427_v52  ;;  %v1485_v19 = vmul.f32 %v1484_v61, %v1467_v53  ;;  %v1474_v40 = vmul.f32 %v1473_v17, %v1467_v53 }
 0x41a   : > { %v1406_v28 = vadd.f32 0.4994258, %v1405_v13  ;;  %v1395_v20 = vadd.f32 0.18741608, %v1394_v60  ;;  %v1435_v39 = vadd.f32 0.18741608, %v1434_v21 }
 0x41b   : > { %v1446_v12 = vadd.f32 0.4994258, %v1445_v16  ;;  %v1486_v6 = vadd.f32 0.4994258, %v1485_v19  ;;  %v1475_v4 = vadd.f32 0.18741608, %v1474_v40  ;;  %v1517_v19 = vpop.permute.xlu1 %1516 }
 0x41c   : > { %v1407_v22 = vmul.f32 %v1406_v28, %v1387_v34  ;;  %v1396_v3 = vmul.f32 %v1395_v20, %v1387_v34  ;;  %v1436_v36 = vmul.f32 %v1435_v39, %v1427_v52  ;;  %v1380_v28 = vmul.f32 0.5, %v2853_v41 }
 0x41d   : > { %v1447_v7 = vmul.f32 %v1446_v12, %v1427_v52  ;;  %v1487_v54 = vmul.f32 %v1486_v6, %v1467_v53  ;;  %v1476_v42 = vmul.f32 %v1475_v4, %v1467_v53  ;;  %v1515_v12 = vpop.permute.xlu0 %1514  ;;  %v1381_v6 = vmul.f32 0.5, %v2855_v25 }
 0x41e   : > { %v1408_v57 = vadd.f32 1.0, %v1407_v22  ;;  %v1397_v37 = vadd.f32 1.1283791, %v1396_v3  ;;  %v1437_v47 = vadd.f32 1.1283791, %v1436_v36  ;;  %v1522_v40 = vsel %vm1520_vm13, %v1515_v12, %v1517_v19 }
 0x41f   : > { %v1448_v31 = vadd.f32 1.0, %v1447_v7  ;;  %v1488_v30 = vadd.f32 1.0, %v1487_v54  ;;  %v1477_v14 = vadd.f32 1.1283791, %v1476_v42  ;;  %v1519_v7 = vpop.permute.xlu2 %1518  ;;  %v1521_v41 = vsel %vm1520_vm13, %v1513_v29, %v1515_v12 }
 0x420   : > { %2006 = vrcp.f32 %v1408_v57  ;;  %v1398_v48 = vmul.f32 %v1397_v37, %v2860_v27  ;;  %v1420_v49 = vand.u32 2147483648, %v1408_v57  ;;  %vm1414_vm3 = vweird.f32 %v1408_v57 }
 0x421   : > { %2008 = vrcp.f32 %v1448_v31  ;;  %v1418_v33 = vand.u32 2147483647, %v1408_v57  ;;  %v1438_v52 = vmul.f32 %v1437_v47, %v2863_v62  ;;  %v1460_v53 = vand.u32 2147483648, %v1448_v31 }
 0x422   : > { %2010 = vrcp.f32 %v1488_v30  ;;  %v1458_v46 = vand.u32 2147483647, %v1448_v31  ;;  %v1421_v26 = vor.u32 1.1754944e-38, %v1420_v49  ;;  %vm1454_vm6 = vweird.f32 %v1448_v31 }
 0x423   : > { %v1500_v27 = vand.u32 2147483648, %v1488_v30  ;;  %v1498_v32 = vand.u32 2147483647, %v1488_v30  ;;  %vm1419_vm14 = vcmp.eq.f32.partialorder %v1418_v33, 8.507059e+37  ;;  %v1461_v62 = vor.u32 1.1754944e-38, %v1460_v53 }
 0x424   : > { %vm1494_vm8 = vweird.f32 %v1488_v30  ;;  %vm1459_vm10 = vcmp.eq.f32.partialorder %v1458_v46, 8.507059e+37  ;;  %v1478_v11 = vmul.f32 %v1477_v14, %v2866_v63 }
 0x425   : > { %v1501_v5 = vor.u32 1.1754944e-38, %v1500_v27  ;;  %vm1499_vm9 = vcmp.eq.f32.partialorder %v1498_v32, 8.507059e+37 }
 0x426   : > { %v2007_v43 = vpop.eup %2006 }
 0x427   : > { %v2009_v44 = vpop.eup %2008  ;;  %v1410_v45 = vmul.f32 %v2007_v43, %v1408_v57  ;;  %vm1415_vm4 = vweird.f32 %v2007_v43  ;;  %v1382_v57 = vmul.f32 0.5, %v2857_v23 }
 0x428   : > { %v1450_v35 = vmul.f32 %v2009_v44, %v1448_v31  ;;  %v2011_v59 = vpop.eup %2010  ;;  %vm1455_vm5 = vweird.f32 %v2009_v44  ;;  %vm1416_vm7 = vmor %vm1414_vm3, %vm1415_vm4 }
 0x429   : > { %v1411_v15 = vsub.f32 1.0, %v1410_v45  ;;  %v1490_v38 = vmul.f32 %v2011_v59, %v1488_v30  ;;  %vm1495_vm11 = vweird.f32 %v2011_v59  ;;  %vm1456_vm15 = vmor %vm1454_vm6, %vm1455_vm5  ;;  %v1523_v30 = vsel %vm1520_vm13, %v1517_v19, %v1519_v7 }
 0x42a   : > { %v1451_v34 = vsub.f32 1.0, %v1450_v35  ;;  %vm1496_vm12 = vmor %vm1494_vm8, %vm1495_vm11 }
 0x42b   : > { %v1412_v50 = vmul.f32 %v2007_v43, %v1411_v15  ;;  %v1491_v8 = vsub.f32 1.0, %v1490_v38 }
 0x42c   : > { %v1452_v51 = vmul.f32 %v2009_v44, %v1451_v34 }
 0x42d   : > { %v1413_v55 = vadd.f32 %v2007_v43, %v1412_v50  ;;  %v1492_v56 = vmul.f32 %v2011_v59, %v1491_v8 }
 0x42e   : > { %v1453_v18 = vadd.f32 %v2009_v44, %v1452_v51 }
 0x42f   : > { %v1417_v10 = vsel %vm1416_vm7, %v2007_v43, %v1413_v55  ;;  %v1493_v0 = vadd.f32 %v2011_v59, %v1492_v56 }
 0x430   : > { %v1422_v2 = vsel %vm1419_vm14, %v1421_v26, %v1417_v10  ;;  %v1457_v58 = vsel %vm1456_vm15, %v2009_v44, %v1453_v18 }
 0x431   : > { %v1423_v24 = vmul.f32 %v1422_v2, %v1398_v48  ;;  %v1462_v1 = vsel %vm1459_vm10, %v1461_v62, %v1457_v58  ;;  %v1497_v61 = vsel %vm1496_vm12, %v2011_v59, %v1493_v0 }
 0x432   : > { %v1463_v9 = vmul.f32 %v1462_v1, %v1438_v52  ;;  %v1502_v60 = vsel %vm1499_vm9, %v1501_v5, %v1497_v61 }
 0x433   : > { %v1672_v13 = vclamps-f32 %v1423_v24, 1.0  ;;  %v1503_v17 = vmul.f32 %v1502_v60, %v1478_v11 }
 0x434   : > { %v1673_v16 = vclamps-f32 %v1463_v9, 1.0 }
 0x435   : > { %v1506_v21 = vadd.f32 1.0, %v1672_v13  ;;  %v1674_v20 = vclamps-f32 %v1503_v17, 1.0 }
 0x436   : > { %v1507_v22 = vadd.f32 1.0, %v1673_v16 }
 0x437   : > { %v1509_v63 = vmul.f32 %v1506_v21, %v1380_v28  ;;  %v1508_v39 = vadd.f32 1.0, %v1674_v20 }
 0x438   : > { %v1510_v54 = vmul.f32 %v1507_v22, %v1381_v6 }
 0x439   : > { %v1527_v31 = vmul.f32 %v1521_v41, %v1509_v63  ;;  %v1511_v25 = vmul.f32 %v1508_v39, %v1382_v57 }
 0x43a   : > { %v1528_v3 = vmul.f32 %v1522_v40, %v1510_v54 }
 0x43b   : > { %1530 = vst [vmem:[%s351_s9] sm:$0xff] %v1527_v31  ;;  %v1529_v4 = vmul.f32 %v1523_v30, %v1511_v25 }
 0x43c   : > { %1531 = vst [vmem:[%s351_s9 + $0x8] sm:$0xff] %v1528_v3 }
 0x43d   : > { %1532 = vst [vmem:[%s351_s9 + $0x10] sm:$0xff] %v1529_v4 }
 0x43e   : > { %2099 = shalt.err (!%p2096_p12)
}
 0x43f   : > { %1687 = dma.vmem_to_hbm [thread:$0]  (%p2266_p3), %s1548_s21, 384, %s1550_s14, %s1534_s17  }
 0x440 PF: > { %s1561_s24 = sand.u32 1, %s2130_s27   ;;  %p2949_p13 = scmp.ge.s32.totalorder %s2142_s30, 2 }
 0x441   : > { %s1562_s22 = scalar_lea.sflag [#allocation4], %s1561_s24 }
 0x442   : > { %p1698_p0 = pnand %p2949_p13, %p2235_p6 }
 0x444   : > { %p1699_p5 = pneg %p1698_p0 }
 0x446   : > { %2125 = dma.done.wait (%p1699_p5), %s1562_s22, 384  }
 0x447   : > { %2127 = vsyncadd (%p1699_p5), %s1562_s22, 4294966912  ;;  %s2950_s15 = sld [smem:[#allocation11_spill]]  ;;  %p22_p7 = scmp.ge.s32.totalorder %s2253_s19, 4  }
 0x448   : > { %s2951_s27 = smov %s2134_s28  ;;  %s2952_s28 = smov %s2138_s29 }
 0x449   : > { %s2954_s30 = smov %s2253_s19  ;;  %24 = sbr.rel (!%p22_p7) target bundleno = 8 (0x8), region = 104 }
 0x44d   : > { %s2953_s29 = smov %s2950_s15 }
 0x44e   :  { %1568 = vsyncpa [#allocation3], 1 }
 0x44f   :  { %1570 = vsyncpa [#allocation3 + $0x1], 1 }
 0x450   :  { %1571 = vsyncpa [#allocation6], 1 }
 0x451   :  { %1572 = vsyncpa [#allocation4], 1 }
 0x452   :  { %1574 = vsyncpa [#allocation4 + $0x1], 1 }

</bundles_post_ra>
